<compile_context>
chip_gen: v7x
topology: tpu7x:2x2x1
jax: 0.10.0
libtpu: 0.0.40
codegen_flags: <defaults>
</compile_context>

<pallas_src>
import math
import jax
import jax.numpy as jnp
from jax.experimental import pallas as pl
from jax.experimental.pallas import tpu as pltpu


def _self_attention_kernel(x_ref, w1_ref, b1_ref, w2_ref, ctx_ref, scores_ref):
    # Grid = (core_split, seq_tiles_per_core).  ctx is accumulated over the inner axis.
    @pl.when(pl.program_id(1) == 0)
    def _init():
        ctx_ref[...] = jnp.zeros_like(ctx_ref)

    x = x_ref[...]                       # (B, TS, D) f32
    w1 = w1_ref[...]                     # (D, 1)  scorer.weight, pre-transposed column
    w2 = w2_ref[...]                     # (1, D)  scorer2.weight as a row (D == 100)
    b1 = b1_ref[0]                       # scalar scorer.bias from SMEM

    B, TS, D = x.shape

    # scorer: Linear(D -> 1).  Run the lane reduction on the MXU (idle otherwise)
    # instead of the XLU: (B*TS, D) @ (D, 1).
    logits = jnp.dot(x.reshape(B * TS, D), w1,
                     preferred_element_type=jnp.float32).reshape(B, TS, 1) + b1
    sig = jax.nn.sigmoid(logits)                                     # (B, TS, 1)

    # scorer2: Linear(1 -> 100).  Bias b2 is constant along the softmax (batch) axis,
    # so it cancels exactly in the post-softmax output and is dropped.
    s = sig * w2                                                     # (B, TS, D)

    # F.softmax with no dim on a 3-D tensor => legacy PyTorch dim=0 (batch axis).
    m = jnp.max(s, axis=0, keepdims=True)
    e = jnp.exp(s - m)
    denom = jnp.sum(e, axis=0, keepdims=True)                        # (1, TS, D)
    inv = pl.reciprocal(denom, approx=True)                          # EUP slot
    inv = inv * (2.0 - denom * inv)                                  # 1 Newton step -> ~f32 exact
    probs = e * inv                                                  # (B, TS, D)

    scores_ref[...] = probs
    # context = sum over the sequence axis; accumulate across sequence tiles.
    ctx_ref[...] += jnp.sum(probs * x, axis=1)[None, :, :]           # (1, B, D)


def _pick_seq_tile(S, target):
    """Sequence tile <= target, multiple of 8, dividing S after optional zero-pad."""
    target = max(8, (target // 8) * 8)
    if S <= target:
        return S, 0                      # single tile: block dim == full array dim
    # Prefer a multiple-of-8 divisor of S in [target/2, target] (no padding needed).
    for ts in range(target, max(7, target // 2 - 1), -8):
        if S % ts == 0:
            return ts, 0
    # Otherwise zero-pad the sequence up to a multiple of the target tile.
    return target, (-S) % target


def self_attention_pallas(x, w1, b1, w2, b2, *, seq_tile=None, core_split=1,
                          vmem_limit_bytes=None):
    """x: (B, S, D) f32;  w1: scorer.weight (1, D);  b1: scorer.bias (1,);
    w2: scorer2.weight (D, 1) [D must be 100];  b2: scorer2.bias (D,) (unused: cancels).

    core_split: set to 2 on v7x (2 TensorCores/chip, CORE_PARALLEL outer axis);
    leave at 1 on v5e/v6e."""
    B, S, D = x.shape
    assert D == 100, "scorer2 emits 100 features; expand_as requires feature_dim == 100"

    if vmem_limit_bytes is None:
        # Safe on every generation incl. v7x (64 MiB physical / 32 MiB scoped default).
        vmem_limit_bytes = 32 * 1024 * 1024

    if seq_tile is None:
        # ~8 live (B, ts, 128-lane) f32 slabs: double-buffered x + scores plus temps.
        bytes_per_row = 8 * B * max(D, 128) * 4
        seq_tile = max(8, min(2048, (vmem_limit_bytes * 3 // 4) // bytes_per_row))
    ts, pad = _pick_seq_tile(S, seq_tile)

    if pad:
        # Zero rows contribute exactly zero to ctx (probs * 0); scores sliced off below.
        x = jnp.pad(x, ((0, 0), (0, pad), (0, 0)))
    s_pad = S + pad
    n_seq_tiles = s_pad // ts

    cs = core_split if (core_split > 0 and n_seq_tiles % core_split == 0) else 1
    n_inner = n_seq_tiles // cs

    # Kernel-friendly weight layouts (no in-kernel transpose); b1 as an SMEM scalar.
    w1_col = jnp.asarray(w1, jnp.float32).reshape(D, 1)
    b1_s = jnp.asarray(b1, jnp.float32).reshape(1)
    w2_row = jnp.asarray(w2, jnp.float32).reshape(1, D)
    del b2  # constant along the batch softmax axis -> cancels exactly

    if cs > 1:
        # Only CORE_PARALLEL actually shards a grid axis across TensorCores (v7x).
        dims = (pltpu.CORE_PARALLEL, pltpu.ARBITRARY)
    else:
        dims = (pltpu.ARBITRARY, pltpu.ARBITRARY)

    ctx_partial, scores = pl.pallas_call(
        _self_attention_kernel,
        out_shape=(
            jax.ShapeDtypeStruct((cs, B, D), jnp.float32),      # per-core partial contexts
            jax.ShapeDtypeStruct((B, s_pad, D), jnp.float32),   # post-softmax scores
        ),
        grid_spec=pltpu.PrefetchScalarGridSpec(
            num_scalar_prefetch=0,
            grid=(cs, n_inner),
            in_specs=[
                pl.BlockSpec((B, ts, D), lambda c, s: (0, c * n_inner + s, 0)),
                pl.BlockSpec((D, 1), lambda c, s: (0, 0)),      # resident across grid steps
                pl.BlockSpec(memory_space=pltpu.MemorySpace.SMEM),   # scalar bias b1
                pl.BlockSpec((1, D), lambda c, s: (0, 0)),      # resident across grid steps
            ],
            out_specs=(
                pl.BlockSpec((1, B, D), lambda c, s: (c, 0, 0)),                # accumulator
                pl.BlockSpec((B, ts, D), lambda c, s: (0, c * n_inner + s, 0)),
            ),
        ),
        compiler_params=pltpu.CompilerParams(
            dimension_semantics=dims,
            vmem_limit_bytes=vmem_limit_bytes,
        ),
    )(x, w1_col, b1_s, w2_row)

    ctx = ctx_partial[0] if cs == 1 else ctx_partial.sum(axis=0)
    if pad:
        scores = scores[:, :S, :]
    return ctx, scores


def self_attention_ref(x, w1, b1, w2, b2):
    # Pure-JAX reference mirroring the PyTorch forward (PyTorch-native weight shapes).
    logits = jnp.einsum("bsd,od->bso", x, w1) + b1            # scorer        (B, S, 1)
    sig = jax.nn.sigmoid(logits)
    scores = jnp.einsum("bso,ko->bsk", sig, w2) + b2          # scorer2       (B, S, 100)
    probs = jax.nn.softmax(scores, axis=0)                    # legacy implicit dim=0
    ctx = jnp.sum(probs * x, axis=1)
    return ctx, probs


if __name__ == "__main__":
    d_hid = 100          # scorer2 outputs 100 features; expand_as requires feature_dim == 100
    B, S = 2, 256

    key = jax.random.PRNGKey(0)
    k_x, k_w1, k_b1, k_w2, k_b2 = jax.random.split(key, 5)

    # reset_parameters: uniform(-stdv, stdv) with stdv = 1/sqrt(d_hid)
    stdv = 1.0 / math.sqrt(d_hid)
    x = jax.random.normal(k_x, (B, S, d_hid), dtype=jnp.float32)
    w1 = jax.random.uniform(k_w1, (1, d_hid), jnp.float32, -stdv, stdv)   # scorer.weight
    b1 = jax.random.uniform(k_b1, (1,),       jnp.float32, -stdv, stdv)   # scorer.bias
    w2 = jax.random.uniform(k_w2, (d_hid, 1), jnp.float32, -stdv, stdv)   # scorer2.weight
    b2 = jax.random.uniform(k_b2, (d_hid,),   jnp.float32, -stdv, stdv)   # scorer2.bias

    ctx_r, scores_r = self_attention_ref(x, w1, b1, w2, b2)

    # 1) Auto tile selection (at this small S this is a single resident tile).
    ctx, scores = self_attention_pallas(x, w1, b1, w2, b2)
    jax.block_until_ready((ctx, scores))
    assert ctx.shape == (B, d_hid) and scores.shape == (B, S, 100)
    assert jnp.allclose(ctx, ctx_r, atol=1e-4, rtol=1e-4), \
        float(jnp.max(jnp.abs(ctx - ctx_r)))
    assert jnp.allclose(scores, scores_r, atol=1e-4, rtol=1e-4), \
        float(jnp.max(jnp.abs(scores - scores_r)))

    # 2) Explicit small tile: exercises the multi-tile pipelined / ctx-accumulation path.
    ctx2, scores2 = self_attention_pallas(x, w1, b1, w2, b2, seq_tile=64)
    jax.block_until_ready((ctx2, scores2))
    assert jnp.allclose(ctx2, ctx_r, atol=1e-4, rtol=1e-4), \
        float(jnp.max(jnp.abs(ctx2 - ctx_r)))
    assert jnp.allclose(scores2, scores_r, atol=1e-4, rtol=1e-4), \
        float(jnp.max(jnp.abs(scores2 - scores_r)))

    # 3) Ragged sequence length: exercises the zero-pad tail path (no `ts = S` fallback).
    S3 = 250
    x3 = x[:, :S3, :]
    ctx3_r, scores3_r = self_attention_ref(x3, w1, b1, w2, b2)
    ctx3, scores3 = self_attention_pallas(x3, w1, b1, w2, b2, seq_tile=64)
    jax.block_until_ready((ctx3, scores3))
    assert ctx3.shape == (B, d_hid) and scores3.shape == (B, S3, 100)
    assert jnp.allclose(ctx3, ctx3_r, atol=1e-4, rtol=1e-4), \
        float(jnp.max(jnp.abs(ctx3 - ctx3_r)))
    assert jnp.allclose(scores3, scores3_r, atol=1e-4, rtol=1e-4), \
        float(jnp.max(jnp.abs(scores3 - scores3_r)))

    print("KERNEL_OK")
</pallas_src>

<mosaic_0001>
module attributes {stable_mosaic.version = 11 : i64} {
  func.func @_self_attention_kernel(%arg0: i32, %arg1: i32, %arg2: memref<2x256x100xf32, #tpu.memory_space<vmem>>, %arg3: memref<100x1xf32, #tpu.memory_space<vmem>>, %arg4: memref<1xf32, #tpu.memory_space<smem>>, %arg5: memref<1x100xf32, #tpu.memory_space<vmem>>, %arg6: memref<1x2x100xf32, #tpu.memory_space<vmem>>, %arg7: memref<2x256x100xf32, #tpu.memory_space<vmem>>) attributes {dimension_semantics = [#tpu.dimension_semantics<arbitrary>, #tpu.dimension_semantics<arbitrary>], iteration_bounds = array<i64: 1, 1>, scalar_prefetch = 0 : i64, scratch_operands = 0 : i64, tpu.core_type = #tpu.core_type<tc>, window_params = [{transform_indices = @transform_0, window_bounds = array<i64: 2, 256, 100>}, {pipeline_mode = #tpu.pipeline_mode<synchronous>, transform_indices = @transform_1, window_bounds = array<i64: 100, 1>}, {transform_indices = @transform_2, window_bounds = array<i64: 1>}, {pipeline_mode = #tpu.pipeline_mode<synchronous>, transform_indices = @transform_3, window_bounds = array<i64: 1, 100>}, {transform_indices = @transform_4, window_bounds = array<i64: 1, 2, 100>}, {transform_indices = @transform_5, window_bounds = array<i64: 2, 256, 100>}]} {
    %c0_i32 = arith.constant 0 : i32
    %0 = arith.cmpi eq, %arg1, %c0_i32 : i32
    %1 = arith.extui %0 : i1 to i32
    %c0_i32_0 = arith.constant 0 : i32
    %2 = arith.cmpi ne, %1, %c0_i32_0 : i32
    scf.if %2 {
      %cst_22 = arith.constant 0.000000e+00 : f32
      %42 = vector.broadcast %cst_22 : f32 to vector<1x2x100xf32>
      %c0_23 = arith.constant 0 : index
      %c0_24 = arith.constant 0 : index
      %c0_25 = arith.constant 0 : index
      %43 = vector.load %arg6[%c0_23, %c0_24, %c0_25] : memref<1x2x100xf32, #tpu.memory_space<vmem>>, vector<1x2x100xf32>
      tpu.vector_store %arg6[%c0_23, %c0_24, %c0_25], %42 {strides = array<i32>} : memref<1x2x100xf32, #tpu.memory_space<vmem>>, vector<1x2x100xf32>,
    } else {
    }
    %c0 = arith.constant 0 : index
    %c0_1 = arith.constant 0 : index
    %c0_2 = arith.constant 0 : index
    %3 = vector.load %arg2[%c0, %c0_1, %c0_2] : memref<2x256x100xf32, #tpu.memory_space<vmem>>, vector<2x256x100xf32>
    %c0_3 = arith.constant 0 : index
    %c0_4 = arith.constant 0 : index
    %4 = vector.load %arg3[%c0_3, %c0_4] : memref<100x1xf32, #tpu.memory_space<vmem>>, vector<100x1xf32>
    %c0_5 = arith.constant 0 : index
    %c0_6 = arith.constant 0 : index
    %5 = vector.load %arg5[%c0_5, %c0_6] : memref<1x100xf32, #tpu.memory_space<vmem>>, vector<1x100xf32>
    %c0_7 = arith.constant 0 : index
    %6 = memref.load %arg4[%c0_7] : memref<1xf32, #tpu.memory_space<smem>>
    %7 = vector.shape_cast %3 : vector<2x256x100xf32> to vector<512x100xf32>
    %cst = arith.constant dense<0.000000e+00> : vector<512x1xf32>
    %8 = tpu.matmul %7, %4, %cst {dimension_numbers = #tpu.dot_dimension_numbers<[1], [0], [0], [1], [0, 0, 1, 1], [], []>} : vector<512x100xf32>, vector<100x1xf32>, vector<512x1xf32> -> vector<512x1xf32>
    %9 = vector.shape_cast %8 : vector<512x1xf32> to vector<2x256x1xf32>
    %10 = vector.broadcast %6 : f32 to vector<2x256x1xf32>
    %11 = arith.addf %9, %10 : vector<2x256x1xf32>
    %12 = arith.negf %11 : vector<2x256x1xf32>
    %13 = math.exp %12 : vector<2x256x1xf32>
    %cst_8 = arith.constant 1.000000e+00 : f32
    %14 = vector.broadcast %cst_8 : f32 to vector<2x256x1xf32>
    %15 = arith.addf %14, %13 : vector<2x256x1xf32>
    %16 = arith.divf %14, %15 : vector<2x256x1xf32>
    %17 = vector.shape_cast %5 : vector<1x100xf32> to vector<1x1x100xf32>
    %18 = vector.broadcast %16 : vector<2x256x1xf32> to vector<2x256x100xf32>
    %19 = vector.broadcast %17 : vector<1x1x100xf32> to vector<2x256x100xf32>
    %20 = arith.mulf %18, %19 : vector<2x256x100xf32>
    %cst_9 = arith.constant dense<0xFF800000> : vector<256x100xf32>
    %21 = vector.multi_reduction <maximumf>, %20, %cst_9 [0] : vector<2x256x100xf32> to vector<256x100xf32>
    %22 = vector.shape_cast %21 : vector<256x100xf32> to vector<1x256x100xf32>
    %23 = vector.broadcast %22 : vector<1x256x100xf32> to vector<2x256x100xf32>
    %24 = arith.subf %20, %23 : vector<2x256x100xf32>
    %25 = math.exp %24 : vector<2x256x100xf32>
    %cst_10 = arith.constant dense<0.000000e+00> : vector<256x100xf32>
    %26 = vector.multi_reduction <add>, %25, %cst_10 [0] : vector<2x256x100xf32> to vector<256x100xf32>
    %27 = vector.shape_cast %26 : vector<256x100xf32> to vector<1x256x100xf32>
    %28 = tpu.reciprocal %27 {approx = true} : vector<1x256x100xf32> -> vector<1x256x100xf32>
    %29 = arith.mulf %27, %28 : vector<1x256x100xf32>
    %cst_11 = arith.constant 2.000000e+00 : f32
    %30 = vector.broadcast %cst_11 : f32 to vector<1x256x100xf32>
    %31 = arith.subf %30, %29 : vector<1x256x100xf32>
    %32 = arith.mulf %28, %31 : vector<1x256x100xf32>
    %33 = vector.broadcast %32 : vector<1x256x100xf32> to vector<2x256x100xf32>
    %34 = arith.mulf %25, %33 : vector<2x256x100xf32>
    %c0_12 = arith.constant 0 : index
    %c0_13 = arith.constant 0 : index
    %c0_14 = arith.constant 0 : index
    %35 = vector.load %arg7[%c0_12, %c0_13, %c0_14] : memref<2x256x100xf32, #tpu.memory_space<vmem>>, vector<2x256x100xf32>
    tpu.vector_store %arg7[%c0_12, %c0_13, %c0_14], %34 {strides = array<i32>} : memref<2x256x100xf32, #tpu.memory_space<vmem>>, vector<2x256x100xf32>,
    %c0_15 = arith.constant 0 : index
    %c0_16 = arith.constant 0 : index
    %c0_17 = arith.constant 0 : index
    %36 = vector.load %arg6[%c0_15, %c0_16, %c0_17] : memref<1x2x100xf32, #tpu.memory_space<vmem>>, vector<1x2x100xf32>
    %37 = arith.mulf %34, %3 : vector<2x256x100xf32>
    %cst_18 = arith.constant dense<0.000000e+00> : vector<2x100xf32>
    %38 = vector.multi_reduction <add>, %37, %cst_18 [1] : vector<2x256x100xf32> to vector<2x100xf32>
    %39 = vector.shape_cast %38 : vector<2x100xf32> to vector<1x2x100xf32>
    %40 = arith.addf %36, %39 : vector<1x2x100xf32>
    %c0_19 = arith.constant 0 : index
    %c0_20 = arith.constant 0 : index
    %c0_21 = arith.constant 0 : index
    %41 = vector.load %arg6[%c0_19, %c0_20, %c0_21] : memref<1x2x100xf32, #tpu.memory_space<vmem>>, vector<1x2x100xf32>
    tpu.vector_store %arg6[%c0_19, %c0_20, %c0_21], %40 {strides = array<i32>} : memref<1x2x100xf32, #tpu.memory_space<vmem>>, vector<1x2x100xf32>,
    return
  }
  func.func @transform_0(%arg0: i32, %arg1: i32) -> (i32, i32, i32) {
    %c1_i32 = arith.constant 1 : i32
    %0 = arith.muli %arg0, %c1_i32 : i32
    %1 = arith.addi %0, %arg1 : i32
    %c0_i32 = arith.constant 0 : i32
    %c0_i32_0 = arith.constant 0 : i32
    %c0_i32_1 = arith.constant 0 : i32
    return %c0_i32, %1, %c0_i32_0 : i32, i32, i32
  }
  func.func @transform_1(%arg0: i32, %arg1: i32) -> (i32, i32) {
    %c0_i32 = arith.constant 0 : i32
    %c0_i32_0 = arith.constant 0 : i32
    %c0_i32_1 = arith.constant 0 : i32
    return %c0_i32, %c0_i32_0 : i32, i32
  }
  func.func @transform_2(%arg0: i32, %arg1: i32) -> i32 {
    %c0_i32 = arith.constant 0 : i32
    %c0_i32_0 = arith.constant 0 : i32
    return %c0_i32 : i32
  }
  func.func @transform_3(%arg0: i32, %arg1: i32) -> (i32, i32) {
    %c0_i32 = arith.constant 0 : i32
    %c0_i32_0 = arith.constant 0 : i32
    %c0_i32_1 = arith.constant 0 : i32
    return %c0_i32, %c0_i32_0 : i32, i32
  }
  func.func @transform_4(%arg0: i32, %arg1: i32) -> (i32, i32, i32) {
    %c0_i32 = arith.constant 0 : i32
    %c0_i32_0 = arith.constant 0 : i32
    %c0_i32_1 = arith.constant 0 : i32
    return %arg0, %c0_i32, %c0_i32_0 : i32, i32, i32
  }
  func.func @transform_5(%arg0: i32, %arg1: i32) -> (i32, i32, i32) {
    %c1_i32 = arith.constant 1 : i32
    %0 = arith.muli %arg0, %c1_i32 : i32
    %1 = arith.addi %0, %arg1 : i32
    %c0_i32 = arith.constant 0 : i32
    %c0_i32_0 = arith.constant 0 : i32
    %c0_i32_1 = arith.constant 0 : i32
    return %c0_i32, %1, %c0_i32_0 : i32, i32, i32
  }
}

</mosaic_0001>

<bundles_post_ra>
// kernel: tpu_custom_call.1
= control target key start
LH: loop header
LB: loop body
LE: loop exit
PB: predicated region body
PF: predicated region fallthrough
CT: control target
= control target key end

     0   :  { %vm142_vm0 = vcmask 818176   ;;  %vm335_vm1 = vcmask 1043456   ;;  %s5120_s0 = inlined_call_operand.vmem [shape: f32[2,256,100], index: 0, kind: input, shape index: {}]   ;;  %s5121_s1 = inlined_call_operand.vmem [shape: f32[100,1], index: 1, kind: input, shape index: {}]   ;;  %s5122_s2 = inlined_call_operand.<no memory space> [shape: f32[1], index: 2, kind: input, shape index: {}]   ;;  %s5123_s3 = inlined_call_operand.vmem [shape: f32[1,100], index: 3, kind: input, shape index: {}]   ;;  %s5124_s4 = inlined_call_operand.hbm [shape: f32[1,2,100], index: 4, kind: output, shape index: {0}]   ;;  %s5125_s5 = inlined_call_operand.vmem [shape: f32[2,256,100], index: 5, kind: output, shape index: {1}]  }
   0x1   :  { %v127_v0 = vld [vmem:[%s5121_s1] sm:$0xff]  ;;  %v128_v1 = vld [vmem:[%s5121_s1 + $0x8] sm:$0xff]  ;;  %v129_v2 = vld [vmem:[%s5121_s1 + $0x10] sm:$0xff] }
   0x2   :  { %v2789_v3 = vpack.c.bf16 %v128_v1, %v127_v0  ;;  %v130_v4 = vld [vmem:[%s5121_s1 + $0x18] sm:$0xff]  ;;  %v131_v6 = vld [vmem:[%s5121_s1 + $0x20] sm:$0xff]  ;;  %v132_v7 = vld [vmem:[%s5121_s1 + $0x28] sm:$0xff] }
   0x3   :  { %v2793_v5 = vpack.c.bf16 %v130_v4, %v129_v2  ;;  %v63_v8 = vld [vmem:[%s5120_s0] sm:$0xff]  ;;  %v2797_v10 = vpack.c.bf16 %v132_v7, %v131_v6  ;;  %v133_v11 = vld [vmem:[%s5121_s1 + $0x30] sm:$0xff]  ;;  %v134_v12 = vld [vmem:[%s5121_s1 + $0x38] sm:$0xff] }
   0x4   :  { %2790 = vmatprep.subr.bf16.mxu0 %v2789_v3  ;;  %2813 = vmatprep.subr.bf16.mxu1 %v2789_v3  ;;  %v95_v9 = vld [vmem:[%s5120_s0 + $0x100] sm:$0xff]  ;;  %v2801_v13 = vpack.c.bf16 %v134_v12, %v133_v11  ;;  %v136_v15 = vld [vmem:[%s5121_s1 + $0x48] sm:$0xff]  ;;  %v137_v17 = vld [vmem:[%s5121_s1 + $0x50] sm:$0xff] }
   0x5   :  { %2792 = vmatpush3.bf16.msra.mxu0 %v2789_v3  ;;  %2820 = vmatpush3.bf16.msra.mxu1 %v2789_v3  ;;  %v135_v14 = vld [vmem:[%s5121_s1 + $0x40] sm:$0xff]  ;;  %v138_v18 = vld [vmem:[%s5121_s1 + $0x58] sm:$0xff] }
   0x6   :  { %2794 = vmatprep.subr.bf16.mxu0 %v2793_v5  ;;  %2814 = vmatprep.subr.bf16.mxu1 %v2793_v5  ;;  %v2805_v16 = vpack.c.bf16 %v136_v15, %v135_v14  ;;  %v2809_v19 = vpack.c.bf16 %v138_v18, %v137_v17  ;;  %v139_v20 = vld [vmem:[%s5121_s1 + $0x60] sm:$0xf] }
   0x7   :  { %2693 = vmatprep.mubr.msk.f32.mxu0 %vm142_vm0, %v63_v8  ;;  %2741 = vmatprep.mubr.msk.f32.mxu1 %vm142_vm0, %v95_v9 }
   0x9   :  { %2796 = vmatpush3.bf16.msra.mxu0 %v2793_v5  ;;  %2821 = vmatpush3.bf16.msra.mxu1 %v2793_v5 }
   0xa   :  { %2798 = vmatprep.subr.bf16.mxu0 %v2797_v10  ;;  %2815 = vmatprep.subr.bf16.mxu1 %v2797_v10 }
   0xd   :  { %2800 = vmatpush3.bf16.msra.mxu0 %v2797_v10  ;;  %2822 = vmatpush3.bf16.msra.mxu1 %v2797_v10 }
   0xe   :  { %2802 = vmatprep.subr.bf16.mxu0 %v2801_v13  ;;  %2816 = vmatprep.subr.bf16.mxu1 %v2801_v13 }
  0x11   :  { %2804 = vmatpush3.bf16.msra.mxu0 %v2801_v13  ;;  %2823 = vmatpush3.bf16.msra.mxu1 %v2801_v13 }
  0x12   :  { %2806 = vmatprep.subr.bf16.mxu0 %v2805_v16  ;;  %2817 = vmatprep.subr.bf16.mxu1 %v2805_v16 }
  0x15   :  { %2808 = vmatpush3.bf16.msra.mxu0 %v2805_v16  ;;  %2824 = vmatpush3.bf16.msra.mxu1 %v2805_v16 }
  0x16   :  { %2810 = vmatprep.subr.bf16.mxu0 %v2809_v19  ;;  %2818 = vmatprep.subr.bf16.mxu1 %v2809_v19 }
  0x19   :  { %2812 = vmatpush3.bf16.msra.mxu0 %v2809_v19  ;;  %2825 = vmatpush3.bf16.msra.mxu1 %v2809_v19 }
  0x1a   :  { %2691 = vmatprep.subr.msk.mxu0 %vm335_vm1, %v139_v20  ;;  %2819 = vmatprep.subr.msk.mxu1 %vm335_vm1, %v139_v20 }
  0x1b   :  { %12 = vsyncpa [#allocation4], 0  ;;  %v64_v21 = vld [vmem:[%s5120_s0 + $0x8] sm:$0xff]  ;;  %v65_v23 = vld [vmem:[%s5120_s0 + $0x10] sm:$0xff]  ;;  %v3369_v19 = vmov 0   ;;  %vm61_vm2 = vcmask 812032  }
  0x1c   :  { %v96_v22 = vld [vmem:[%s5120_s0 + $0x108] sm:$0xff]  ;;  %v97_v24 = vld [vmem:[%s5120_s0 + $0x110] sm:$0xff]  ;;  %v66_v25 = vld [vmem:[%s5120_s0 + $0x18] sm:$0xff]  ;;  %2830 = vset.pattern.permute.xlu0 %v3369_v19  ;;  %2831 = vset.pattern.permute.xlu1 %v3369_v19  ;;  %vm2408_vm3 = vcmask 1041409  }
  0x1d   :  { %2692 = vmatpush3.msk.msra.mxu0 %vm335_vm1, %v139_v20  ;;  %2826 = vmatpush3.msk.msra.mxu1 %vm335_vm1, %v139_v20  ;;  %v98_v26 = vld [vmem:[%s5120_s0 + $0x118] sm:$0xff]  ;;  %v67_v27 = vld [vmem:[%s5120_s0 + $0x20] sm:$0xff]  ;;  %v68_v29 = vld [vmem:[%s5120_s0 + $0x28] sm:$0xff]  ;;  %v3700_v20 = vstv %s5122_s2 }
  0x1e   :  { %2694 = vmatmul.mubr.msk.f32.vlgmr.msra.gmra.mrb[0].mxu0 %vm142_vm0, %v64_v21  ;;  %2742 = vmatmul.mubr.msk.f32.vlgmr.msra.gmra.mrb[0].mxu1 %vm142_vm0, %v96_v22  ;;  %v99_v28 = vld [vmem:[%s5120_s0 + $0x120] sm:$0xff]  ;;  %v100_v30 = vld [vmem:[%s5120_s0 + $0x128] sm:$0xff]  ;;  %v69_v31 = vld [vmem:[%s5120_s0 + $0x30] sm:$0xff] }
  0x1f   :  { %2696 = vmatprep.mubr.msk.f32.mxu0 %vm142_vm0, %v65_v23  ;;  %2744 = vmatprep.mubr.msk.f32.mxu1 %vm142_vm0, %v97_v24  ;;  %v101_v32 = vld [vmem:[%s5120_s0 + $0x130] sm:$0xff]  ;;  %v70_v33 = vld [vmem:[%s5120_s0 + $0x38] sm:$0xff]  ;;  %v71_v35 = vld [vmem:[%s5120_s0 + $0x40] sm:$0xff] }
  0x20   :  { %v102_v34 = vld [vmem:[%s5120_s0 + $0x138] sm:$0xff]  ;;  %v103_v36 = vld [vmem:[%s5120_s0 + $0x140] sm:$0xff]  ;;  %v72_v37 = vld [vmem:[%s5120_s0 + $0x48] sm:$0xff] }
  0x21   :  { %v104_v38 = vld [vmem:[%s5120_s0 + $0x148] sm:$0xff]  ;;  %v73_v39 = vld [vmem:[%s5120_s0 + $0x50] sm:$0xff]  ;;  %v74_v41 = vld [vmem:[%s5120_s0 + $0x58] sm:$0xff] }
  0x22   :  { %2697 = vmatmul.mubr.msk.f32.gmra.mrb[2].mxu0 %vm142_vm0, %v66_v25  ;;  %2745 = vmatmul.mubr.msk.f32.gmra.mrb[2].mxu1 %vm142_vm0, %v98_v26  ;;  %v105_v40 = vld [vmem:[%s5120_s0 + $0x150] sm:$0xff]  ;;  %v106_v42 = vld [vmem:[%s5120_s0 + $0x158] sm:$0xff]  ;;  %v75_v43 = vld [vmem:[%s5120_s0 + $0x60] sm:$0xff] }
  0x23   :  { %2699 = vmatprep.mubr.msk.f32.mxu0 %vm142_vm0, %v67_v27  ;;  %2747 = vmatprep.mubr.msk.f32.mxu1 %vm142_vm0, %v99_v28  ;;  %v107_v44 = vld [vmem:[%s5120_s0 + $0x160] sm:$0xff]  ;;  %v76_v45 = vld [vmem:[%s5120_s0 + $0x68] sm:$0xff]  ;;  %v77_v47 = vld [vmem:[%s5120_s0 + $0x70] sm:$0xff] }
  0x24   :  { %v108_v46 = vld [vmem:[%s5120_s0 + $0x168] sm:$0xff]  ;;  %v109_v48 = vld [vmem:[%s5120_s0 + $0x170] sm:$0xff]  ;;  %v78_v49 = vld [vmem:[%s5120_s0 + $0x78] sm:$0xff] }
  0x25   :  { %v110_v50 = vld [vmem:[%s5120_s0 + $0x178] sm:$0xff]  ;;  %v79_v51 = vld [vmem:[%s5120_s0 + $0x80] sm:$0xff]  ;;  %v80_v53 = vld [vmem:[%s5120_s0 + $0x88] sm:$0xff] }
  0x26   :  { %2700 = vmatmul.mubr.msk.f32.gmra.mrb[4].mxu0 %vm142_vm0, %v68_v29  ;;  %2748 = vmatmul.mubr.msk.f32.gmra.mrb[4].mxu1 %vm142_vm0, %v100_v30  ;;  %v111_v52 = vld [vmem:[%s5120_s0 + $0x180] sm:$0xff]  ;;  %v112_v54 = vld [vmem:[%s5120_s0 + $0x188] sm:$0xff]  ;;  %v81_v55 = vld [vmem:[%s5120_s0 + $0x90] sm:$0xff] }
  0x27   :  { %2702 = vmatprep.mubr.msk.f32.mxu0 %vm142_vm0, %v69_v31  ;;  %2750 = vmatprep.mubr.msk.f32.mxu1 %vm142_vm0, %v101_v32  ;;  %v113_v56 = vld [vmem:[%s5120_s0 + $0x190] sm:$0xff]  ;;  %v82_v57 = vld [vmem:[%s5120_s0 + $0x98] sm:$0xff]  ;;  %v83_v59 = vld [vmem:[%s5120_s0 + $0xa0] sm:$0xff] }
  0x28   :  { %v114_v58 = vld [vmem:[%s5120_s0 + $0x198] sm:$0xff]  ;;  %v115_v60 = vld [vmem:[%s5120_s0 + $0x1a0] sm:$0xff]  ;;  %v84_v61 = vld [vmem:[%s5120_s0 + $0xa8] sm:$0xff] }
  0x29   :  { %v116_v62 = vld [vmem:[%s5120_s0 + $0x1a8] sm:$0xff]  ;;  %v85_v63 = vld [vmem:[%s5120_s0 + $0xb0] sm:$0xff]  ;;  %v86_v1 = vld [vmem:[%s5120_s0 + $0xb8] sm:$0xff] }
  0x2a   :  { %2703 = vmatmul.mubr.msk.f32.gmra.mrb[6].mxu0 %vm142_vm0, %v70_v33  ;;  %2751 = vmatmul.mubr.msk.f32.gmra.mrb[6].mxu1 %vm142_vm0, %v102_v34  ;;  %v117_v0 = vld [vmem:[%s5120_s0 + $0x1b0] sm:$0xff]  ;;  %v118_v2 = vld [vmem:[%s5120_s0 + $0x1b8] sm:$0xff]  ;;  %v87_v3 = vld [vmem:[%s5120_s0 + $0xc0] sm:$0xff] }
  0x2b   :  { %2705 = vmatprep.mubr.msk.f32.mxu0 %vm142_vm0, %v71_v35  ;;  %2753 = vmatprep.mubr.msk.f32.mxu1 %vm142_vm0, %v103_v36  ;;  %v119_v4 = vld [vmem:[%s5120_s0 + $0x1c0] sm:$0xff]  ;;  %v88_v5 = vld [vmem:[%s5120_s0 + $0xc8] sm:$0xff]  ;;  %v89_v7 = vld [vmem:[%s5120_s0 + $0xd0] sm:$0xff] }
  0x2c   :  { %v120_v6 = vld [vmem:[%s5120_s0 + $0x1c8] sm:$0xff]  ;;  %v121_v8 = vld [vmem:[%s5120_s0 + $0x1d0] sm:$0xff]  ;;  %v90_v9 = vld [vmem:[%s5120_s0 + $0xd8] sm:$0xff] }
  0x2d   :  { %v122_v10 = vld [vmem:[%s5120_s0 + $0x1d8] sm:$0xff]  ;;  %v91_v11 = vld [vmem:[%s5120_s0 + $0xe0] sm:$0xff]  ;;  %v92_v13 = vld [vmem:[%s5120_s0 + $0xe8] sm:$0xff] }
  0x2e   :  { %2706 = vmatmul.mubr.msk.f32.gmra.mrb[8].mxu0 %vm142_vm0, %v72_v37  ;;  %2754 = vmatmul.mubr.msk.f32.gmra.mrb[8].mxu1 %vm142_vm0, %v104_v38  ;;  %v123_v12 = vld [vmem:[%s5120_s0 + $0x1e0] sm:$0xff]  ;;  %v124_v14 = vld [vmem:[%s5120_s0 + $0x1e8] sm:$0xff]  ;;  %v93_v15 = vld [vmem:[%s5120_s0 + $0xf0] sm:$0xff] }
  0x2f   :  { %2708 = vmatprep.mubr.msk.f32.mxu0 %vm142_vm0, %v73_v39  ;;  %2756 = vmatprep.mubr.msk.f32.mxu1 %vm142_vm0, %v105_v40  ;;  %v125_v16 = vld [vmem:[%s5120_s0 + $0x1f0] sm:$0xff]  ;;  %v94_v17 = vld [vmem:[%s5120_s0 + $0xf8] sm:$0xff] }
  0x30   :  { %v126_v18 = vld [vmem:[%s5120_s0 + $0x1f8] sm:$0xff] }
  0x32   :  { %2709 = vmatmul.mubr.msk.f32.gmra.mrb[10].mxu0 %vm142_vm0, %v74_v41  ;;  %2757 = vmatmul.mubr.msk.f32.gmra.mrb[10].mxu1 %vm142_vm0, %v106_v42 }
  0x33   :  { %2711 = vmatprep.mubr.msk.f32.mxu0 %vm142_vm0, %v75_v43  ;;  %2759 = vmatprep.mubr.msk.f32.mxu1 %vm142_vm0, %v107_v44 }
  0x36   :  { %2712 = vmatmul.mubr.msk.f32.gmra.mrb[12].mxu0 %vm142_vm0, %v76_v45  ;;  %2760 = vmatmul.mubr.msk.f32.gmra.mrb[12].mxu1 %vm142_vm0, %v108_v46 }
  0x37   :  { %2714 = vmatprep.mubr.msk.f32.mxu0 %vm142_vm0, %v77_v47  ;;  %2762 = vmatprep.mubr.msk.f32.mxu1 %vm142_vm0, %v109_v48 }
  0x3a   :  { %2715 = vmatmul.mubr.msk.f32.gmra.mrb[14].mxu0 %vm142_vm0, %v78_v49  ;;  %2763 = vmatmul.mubr.msk.f32.gmra.mrb[14].mxu1 %vm142_vm0, %v110_v50 }
  0x3b   :  { %2717 = vmatprep.mubr.msk.f32.mxu0 %vm142_vm0, %v79_v51  ;;  %2765 = vmatprep.mubr.msk.f32.mxu1 %vm142_vm0, %v111_v52 }
  0x3e   :  { %2718 = vmatmul.mubr.msk.f32.gmra.mrb[16].mxu0 %vm142_vm0, %v80_v53  ;;  %2766 = vmatmul.mubr.msk.f32.gmra.mrb[16].mxu1 %vm142_vm0, %v112_v54 }
  0x3f   :  { %2720 = vmatprep.mubr.msk.f32.mxu0 %vm142_vm0, %v81_v55  ;;  %2768 = vmatprep.mubr.msk.f32.mxu1 %vm142_vm0, %v113_v56 }
  0x42   :  { %2721 = vmatmul.mubr.msk.f32.gmra.mrb[18].mxu0 %vm142_vm0, %v82_v57  ;;  %2769 = vmatmul.mubr.msk.f32.gmra.mrb[18].mxu1 %vm142_vm0, %v114_v58 }
  0x43   :  { %2723 = vmatprep.mubr.msk.f32.mxu0 %vm142_vm0, %v83_v59  ;;  %2771 = vmatprep.mubr.msk.f32.mxu1 %vm142_vm0, %v115_v60 }
  0x46   :  { %2724 = vmatmul.mubr.msk.f32.gmra.mrb[20].mxu0 %vm142_vm0, %v84_v61  ;;  %2772 = vmatmul.mubr.msk.f32.gmra.mrb[20].mxu1 %vm142_vm0, %v116_v62 }
  0x47   :  { %2726 = vmatprep.mubr.msk.f32.mxu0 %vm142_vm0, %v85_v63  ;;  %2774 = vmatprep.mubr.msk.f32.mxu1 %vm142_vm0, %v117_v0 }
  0x4a   :  { %2727 = vmatmul.mubr.msk.f32.gmra.mrb[22].mxu0 %vm142_vm0, %v86_v1  ;;  %2775 = vmatmul.mubr.msk.f32.gmra.mrb[22].mxu1 %vm142_vm0, %v118_v2 }
  0x4b   :  { %2729 = vmatprep.mubr.msk.f32.mxu0 %vm142_vm0, %v87_v3  ;;  %2777 = vmatprep.mubr.msk.f32.mxu1 %vm142_vm0, %v119_v4 }
  0x4e   :  { %2730 = vmatmul.mubr.msk.f32.gmra.mrb[24].mxu0 %vm142_vm0, %v88_v5  ;;  %2778 = vmatmul.mubr.msk.f32.gmra.mrb[24].mxu1 %vm142_vm0, %v120_v6 }
  0x4f   :  { %2732 = vmatprep.mubr.msk.f32.mxu0 %vm142_vm0, %v89_v7  ;;  %2780 = vmatprep.mubr.msk.f32.mxu1 %vm142_vm0, %v121_v8 }
  0x52   :  { %2733 = vmatmul.mubr.msk.f32.gmra.mrb[26].mxu0 %vm142_vm0, %v90_v9  ;;  %2781 = vmatmul.mubr.msk.f32.gmra.mrb[26].mxu1 %vm142_vm0, %v122_v10 }
  0x53   :  { %2735 = vmatprep.mubr.msk.f32.mxu0 %vm142_vm0, %v91_v11  ;;  %2783 = vmatprep.mubr.msk.f32.mxu1 %vm142_vm0, %v123_v12 }
  0x56   :  { %2736 = vmatmul.mubr.msk.f32.gmra.mrb[28].mxu0 %vm142_vm0, %v92_v13  ;;  %2784 = vmatmul.mubr.msk.f32.gmra.mrb[28].mxu1 %vm142_vm0, %v124_v14 }
  0x57   :  { %2738 = vmatprep.mubr.msk.f32.mxu0 %vm142_vm0, %v93_v15  ;;  %2786 = vmatprep.mubr.msk.f32.mxu1 %vm142_vm0, %v125_v16 }
  0x5a   :  { %2739 = vmatmul.mubr.msk.f32.gmra.mrb[30].mxu0 %vm142_vm0, %v94_v17  ;;  %2787 = vmatmul.mubr.msk.f32.gmra.mrb[30].mxu1 %vm142_vm0, %v126_v18 }
  0xf1   :  { %v2695_v21 = vpop.f32.mrb[0].mxu0  ;;  %v2743_v22 = vpop.f32.mrb[0].mxu1 }
  0xf2   :  { %v726_v23 = vadd.f32 %v2695_v21, %v3700_v20  ;;  %v758_v24 = vadd.f32 %v2743_v22, %v3700_v20  ;;  %v405_v25 = vpop.f32.mrb[1].mxu0  ;;  %v565_v26 = vpop.f32.mrb[1].mxu1 }
  0xf3   :  { %v725_v27 = vadd.f32 %v3700_v20, %v405_v25  ;;  %v757_v28 = vadd.f32 %v3700_v20, %v565_v26 }
  0xf4   :  { %v2526_v29 = vmul.f32 -1.442695, %v726_v23  ;;  %v2558_v30 = vmul.f32 -1.442695, %v758_v24 }
  0xf5   :  { %v2525_v31 = vmul.f32 -1.442695, %v725_v27  ;;  %v2557_v32 = vmul.f32 -1.442695, %v757_v28  ;;  %v2698_v33 = vpop.f32.mrb[2].mxu0  ;;  %v2746_v34 = vpop.f32.mrb[2].mxu1 }
  0xf6   :  { %2832 = vpow2.f32 %v2526_v29  ;;  %v728_v35 = vadd.f32 %v2698_v33, %v3700_v20  ;;  %v415_v36 = vpop.f32.mrb[3].mxu0  ;;  %v760_v37 = vadd.f32 %v2746_v34, %v3700_v20  ;;  %v575_v38 = vpop.f32.mrb[3].mxu1 }
  0xf7   :  { %2834 = vpow2.f32 %v2558_v30  ;;  %v727_v39 = vadd.f32 %v3700_v20, %v415_v36  ;;  %v759_v40 = vadd.f32 %v3700_v20, %v575_v38 }
  0xf8   :  { %2836 = vpow2.f32 %v2525_v31  ;;  %v2528_v41 = vmul.f32 -1.442695, %v728_v35  ;;  %v2560_v42 = vmul.f32 -1.442695, %v760_v37 }
  0xf9   :  { %2838 = vpow2.f32 %v2557_v32  ;;  %v2527_v43 = vmul.f32 -1.442695, %v727_v39  ;;  %v2559_v44 = vmul.f32 -1.442695, %v759_v40  ;;  %v2701_v45 = vpop.f32.mrb[4].mxu0  ;;  %v2749_v46 = vpop.f32.mrb[4].mxu1 }
  0xfa   :  { %2840 = vpow2.f32 %v2528_v41  ;;  %v730_v47 = vadd.f32 %v2701_v45, %v3700_v20  ;;  %v762_v48 = vadd.f32 %v2749_v46, %v3700_v20  ;;  %v425_v49 = vpop.f32.mrb[5].mxu0  ;;  %v585_v50 = vpop.f32.mrb[5].mxu1 }
  0xfb   :  { %2842 = vpow2.f32 %v2527_v43  ;;  %v729_v51 = vadd.f32 %v3700_v20, %v425_v49  ;;  %v761_v52 = vadd.f32 %v3700_v20, %v585_v50 }
  0xfc   :  { %2844 = vpow2.f32 %v2560_v42  ;;  %v2530_v53 = vmul.f32 -1.442695, %v730_v47  ;;  %v2562_v54 = vmul.f32 -1.442695, %v762_v48 }
  0xfd   :  { %2846 = vpow2.f32 %v2559_v44  ;;  %v2529_v55 = vmul.f32 -1.442695, %v729_v51  ;;  %v2561_v56 = vmul.f32 -1.442695, %v761_v52  ;;  %v2704_v57 = vpop.f32.mrb[6].mxu0  ;;  %v2752_v58 = vpop.f32.mrb[6].mxu1 }
  0xfe   :  { %2848 = vpow2.f32 %v2530_v53  ;;  %v732_v59 = vadd.f32 %v2704_v57, %v3700_v20  ;;  %v435_v60 = vpop.f32.mrb[7].mxu0  ;;  %v595_v61 = vpop.f32.mrb[7].mxu1  ;;  %v764_v22 = vadd.f32 %v2752_v58, %v3700_v20 }
  0xff   :  { %2850 = vpow2.f32 %v2562_v54  ;;  %v731_v28 = vadd.f32 %v3700_v20, %v435_v60  ;;  %v763_v32 = vadd.f32 %v3700_v20, %v595_v61 }
 0x100   :  { %v2833_v62 = vpop.eup %2832  ;;  %2852 = vpow2.f32 %v2529_v55  ;;  %v2532_v63 = vmul.f32 -1.442695, %v732_v59  ;;  %v2564_v37 = vmul.f32 -1.442695, %v764_v22 }
 0x101   :  { %v2835_v0 = vpop.eup %2834  ;;  %v982_v1 = vadd.f32 1.0, %v2833_v62  ;;  %2854 = vpow2.f32 %v2561_v56  ;;  %v2707_v2 = vpop.f32.mrb[8].mxu0  ;;  %v2531_v46 = vmul.f32 -1.442695, %v731_v28  ;;  %v2563_v50 = vmul.f32 -1.442695, %v763_v32 }
 0x102   :  { %v2837_v3 = vpop.eup %2836  ;;  %v1014_v4 = vadd.f32 1.0, %v2835_v0  ;;  %2856 = vpow2.f32 %v2532_v63  ;;  %v2755_v5 = vpop.f32.mrb[8].mxu1  ;;  %v734_v38 = vadd.f32 %v2707_v2, %v3700_v20 }
 0x103   :  { %v445_v6 = vpop.f32.mrb[9].mxu0  ;;  %v2839_v7 = vpop.eup %2838  ;;  %2858 = vrcp.f32 %v982_v1  ;;  %v981_v8 = vadd.f32 1.0, %v2837_v3  ;;  %v766_v42 = vadd.f32 %v2755_v5, %v3700_v20 }
 0x104   :  { %v605_v9 = vpop.f32.mrb[9].mxu1  ;;  %v2841_v10 = vpop.eup %2840  ;;  %2860 = vrcp.f32 %v1014_v4  ;;  %v1013_v11 = vadd.f32 1.0, %v2839_v7  ;;  %v733_v43 = vadd.f32 %v3700_v20, %v445_v6  ;;  %v2534_v55 = vmul.f32 -1.442695, %v734_v38 }
 0x105   :  { %v2843_v12 = vpop.eup %2842  ;;  %2862 = vrcp.f32 %v981_v8  ;;  %v984_v13 = vadd.f32 1.0, %v2841_v10  ;;  %v2710_v14 = vpop.f32.mrb[10].mxu0  ;;  %v765_v47 = vadd.f32 %v3700_v20, %v605_v9  ;;  %v2566_v58 = vmul.f32 -1.442695, %v766_v42 }
 0x106   :  { %v2845_v15 = vpop.eup %2844  ;;  %2864 = vrcp.f32 %v1013_v11  ;;  %v983_v16 = vadd.f32 1.0, %v2843_v12  ;;  %v2758_v17 = vpop.f32.mrb[10].mxu1  ;;  %v736_v51 = vadd.f32 %v2710_v14, %v3700_v20  ;;  %v2533_v59 = vmul.f32 -1.442695, %v733_v43 }
 0x107   :  { %v455_v18 = vpop.f32.mrb[11].mxu0  ;;  %v2847_v19 = vpop.eup %2846  ;;  %2866 = vrcp.f32 %v984_v13  ;;  %v1016_v21 = vadd.f32 1.0, %v2845_v15  ;;  %v768_v60 = vadd.f32 %v2758_v17, %v3700_v20  ;;  %v2565_v62 = vmul.f32 -1.442695, %v765_v47 }
 0x108   :  { %v615_v23 = vpop.f32.mrb[11].mxu1  ;;  %v2849_v24 = vpop.eup %2848  ;;  %2868 = vrcp.f32 %v983_v16  ;;  %v1015_v25 = vadd.f32 1.0, %v2847_v19  ;;  %v735_v0 = vadd.f32 %v3700_v20, %v455_v18  ;;  %v2536_v4 = vmul.f32 -1.442695, %v736_v51 }
 0x109   :  { %v2851_v26 = vpop.eup %2850  ;;  %2870 = vrcp.f32 %v1016_v21  ;;  %v986_v27 = vadd.f32 1.0, %v2849_v24  ;;  %v2713_v29 = vpop.f32.mrb[12].mxu0  ;;  %v767_v63 = vadd.f32 %v3700_v20, %v615_v23  ;;  %v2568_v14 = vmul.f32 -1.442695, %v768_v60 }
 0x10a   :  { %v2853_v30 = vpop.eup %2852  ;;  %2872 = vrcp.f32 %v1015_v25  ;;  %v1018_v31 = vadd.f32 1.0, %v2851_v26  ;;  %v2761_v33 = vpop.f32.mrb[12].mxu1  ;;  %v738_v10 = vadd.f32 %v2713_v29, %v3700_v20  ;;  %v2535_v22 = vmul.f32 -1.442695, %v735_v0 }
 0x10b   :  { %v3718_v34 = vpop.f32.mrb[13].mxu0  ;;  %v2855_v35 = vpop.eup %2854  ;;  %2874 = vrcp.f32 %v986_v27  ;;  %v985_v36 = vadd.f32 1.0, %v2853_v30  ;;  %v770_v15 = vadd.f32 %v2761_v33, %v3700_v20  ;;  %v2567_v17 = vmul.f32 -1.442695, %v767_v63 }
 0x10c   :  { %v3721_v39 = vpop.f32.mrb[13].mxu1  ;;  %v2857_v40 = vpop.eup %2856  ;;  %2876 = vrcp.f32 %v1018_v31  ;;  %v1017_v41 = vadd.f32 1.0, %v2855_v35  ;;  %v2538_v28 = vmul.f32 -1.442695, %v738_v10 }
 0x10d   :  { %v2859_v44 = vpop.eup %2858  ;;  %2878 = vrcp.f32 %v985_v36  ;;  %v988_v45 = vadd.f32 1.0, %v2857_v40  ;;  %v3726_v48 = vpop.f32.mrb[14].mxu0  ;;  %v2570_v32 = vmul.f32 -1.442695, %v770_v15 }
 0x10e   :  { %v2861_v49 = vpop.eup %2860  ;;  %2880 = vrcp.f32 %v1017_v41  ;;  %1180 = vperm.xlu0 %2830, %v2859_v44   ;;  %v3729_v52 = vpop.f32.mrb[14].mxu1 }
 0x10f   :  { %v3731_v53 = vpop.f32.mrb[15].mxu0  ;;  %v2863_v54 = vpop.eup %2862  ;;  %2882 = vrcp.f32 %v988_v45 }
 0x110   :  { %v3733_v56 = vpop.f32.mrb[15].mxu1  ;;  %v2865_v57 = vpop.eup %2864  ;;  %2884 = vpow2.f32 %v2564_v37 }
 0x111   :  { %v2867_v61 = vpop.eup %2866  ;;  %2886 = vpow2.f32 %v2531_v46  ;;  %1335 = vperm.xlu1 %2831, %v2865_v57   ;;  %v2719_v1 = vpop.f32.mrb[16].mxu0 }
 0x112   :  { %v2767_v2 = vpop.f32.mrb[16].mxu1  ;;  %v2869_v3 = vpop.eup %2868  ;;  %2888 = vpow2.f32 %v2563_v50  ;;  %1340 = vperm.xlu0 %2830, %v2861_v49   ;;  %v3739_v5 = vadd.f32 %v2719_v1, %v3700_v20 }
 0x113   :  { %v3742_v6 = vadd.f32 %v2767_v2, %v3700_v20  ;;  %v645_v7 = vpop.f32.mrb[17].mxu1  ;;  %v485_v8 = vpop.f32.mrb[17].mxu0  ;;  %2890 = vpow2.f32 %v2534_v55 }
 0x114   :  { %v2871_v9 = vpop.eup %2870  ;;  %v3746_v11 = vadd.f32 %v3700_v20, %v645_v7  ;;  %v3749_v12 = vadd.f32 %v3700_v20, %v485_v8  ;;  %2892 = vpow2.f32 %v2566_v58 }
 0x115   :  { %v2873_v13 = vpop.eup %2872  ;;  %2894 = vpow2.f32 %v2565_v62  ;;  %1190 = vperm.xlu1 %2831, %v2867_v61   ;;  %v2722_v18 = vpop.f32.mrb[18].mxu0 }
 0x116   :  { %v3752_v16 = vpop.eup %2874  ;;  %v2770_v19 = vpop.f32.mrb[18].mxu1  ;;  %2896 = vpow2.f32 %v2533_v59  ;;  %1175 = vperm.xlu0 %2830, %v2863_v54   ;;  %v3755_v23 = vadd.f32 %v2722_v18, %v3700_v20  ;;  %v737_v54 = vadd.f32 %v3700_v20, %v3718_v34  ;;  %v769_v59 = vadd.f32 %v3700_v20, %v3721_v39 }
 0x117   :  { %v2877_v21 = vpop.eup %2876  ;;  %v3758_v24 = vadd.f32 %v2770_v19, %v3700_v20  ;;  %v655_v25 = vpop.f32.mrb[19].mxu1  ;;  %2898 = vpow2.f32 %v2536_v4 }
 0x118   :  { %v495_v26 = vpop.f32.mrb[19].mxu0  ;;  %v2879_v27 = vpop.eup %2878  ;;  %v3761_v29 = vadd.f32 %v3700_v20, %v655_v25  ;;  %2900 = vpow2.f32 %v2568_v14  ;;  %v2569_v15 = vmul.f32 -1.442695, %v769_v59 }
 0x119   :  { %v3764_v30 = vadd.f32 %v3700_v20, %v495_v26  ;;  %v3766_v31 = vpop.eup %2880  ;;  %1185 = vperm.xlu1 %2831, %v2869_v3   ;;  %2902 = vpow2.f32 %v2567_v17  ;;  %v2725_v35 = vpop.f32.mrb[20].mxu0 }
 0x11a   :  { %v3768_v33 = vpop.eup %2882  ;;  %v2773_v36 = vpop.f32.mrb[20].mxu1  ;;  %1350 = vperm.xlu0 %2830, %v2871_v9   ;;  %2904 = vpow2.f32 %v2535_v22  ;;  %v3771_v38 = vadd.f32 %v2725_v35, %v3700_v20  ;;  %v2537_v9 = vmul.f32 -1.442695, %v737_v54 }
 0x11b   :  { %v2885_v37 = vpop.eup %2884  ;;  %v3774_v40 = vadd.f32 %v2773_v36, %v3700_v20  ;;  %v665_v41 = vpop.f32.mrb[21].mxu1  ;;  %2906 = vpow2.f32 %v2538_v28 }
 0x11c   :  { %v505_v42 = vpop.f32.mrb[21].mxu0  ;;  %v2887_v43 = vpop.eup %2886  ;;  %v1020_v44 = vadd.f32 1.0, %v2885_v37  ;;  %v3777_v45 = vadd.f32 %v3700_v20, %v665_v41  ;;  %2908 = vpow2.f32 %v2570_v32  ;;  %v772_v41 = vadd.f32 %v3729_v52, %v3700_v20 }
 0x11d   :  { %v3780_v46 = vadd.f32 %v3700_v20, %v505_v42  ;;  %v2889_v47 = vpop.eup %2888  ;;  %v987_v49 = vadd.f32 1.0, %v2887_v43  ;;  %1345 = vperm.xlu1 %2831, %v2873_v13   ;;  %v2728_v55 = vpop.f32.mrb[22].mxu0  ;;  %v739_v42 = vadd.f32 %v3700_v20, %v3731_v53 }
 0x11e   :  { %v2891_v50 = vpop.eup %2890  ;;  %2910 = vrcp.f32 %v1020_v44  ;;  %v1019_v51 = vadd.f32 1.0, %v2889_v47  ;;  %1360 = vperm.xlu0 %2830, %v2877_v21   ;;  %v3787_v60 = vadd.f32 %v2728_v55, %v3700_v20  ;;  %v2776_v61 = vpop.f32.mrb[22].mxu1 }
 0x11f   :  { %v2893_v57 = vpop.eup %2892  ;;  %2912 = vrcp.f32 %v987_v49  ;;  %v990_v58 = vadd.f32 1.0, %v2891_v50  ;;  %v515_v62 = vpop.f32.mrb[23].mxu0  ;;  %v3790_v1 = vadd.f32 %v2776_v61, %v3700_v20  ;;  %v2572_v61 = vmul.f32 -1.442695, %v772_v41 }
 0x120   :  { %v2895_v63 = vpop.eup %2894  ;;  %2914 = vrcp.f32 %v1019_v51  ;;  %v1022_v0 = vadd.f32 1.0, %v2893_v57  ;;  %v675_v34 = vpop.f32.mrb[23].mxu1  ;;  %v3793_v2 = vadd.f32 %v3700_v20, %v515_v62  ;;  %v2541_v41 = vmul.f32 -1.442695, %v3749_v12 }
 0x121   :  { %v2897_v3 = vpop.eup %2896  ;;  %2916 = vrcp.f32 %v990_v58  ;;  %v1021_v4 = vadd.f32 1.0, %v2895_v63  ;;  %v3796_v39 = vadd.f32 %v3700_v20, %v675_v34  ;;  %1200 = vperm.xlu1 %2831, %v3752_v16   ;;  %v2731_v10 = vpop.f32.mrb[24].mxu0  ;;  %v2575_v12 = vmul.f32 -1.442695, %v3761_v29 }
 0x122   :  { %v2899_v7 = vpop.eup %2898  ;;  %2918 = vrcp.f32 %v1022_v0  ;;  %v989_v8 = vadd.f32 1.0, %v2897_v3  ;;  %1195 = vperm.xlu0 %2830, %v2879_v27   ;;  %v3800_v17 = vadd.f32 %v2731_v10, %v3700_v20  ;;  %v2779_v18 = vpop.f32.mrb[24].mxu1  ;;  %v740_v27 = vadd.f32 %v3726_v48, %v3700_v20 }
 0x123   :  { %v2901_v13 = vpop.eup %2900  ;;  %2920 = vrcp.f32 %v1021_v4  ;;  %v992_v14 = vadd.f32 1.0, %v2899_v7  ;;  %v525_v19 = vpop.f32.mrb[25].mxu0  ;;  %v3803_v25 = vadd.f32 %v2779_v18, %v3700_v20  ;;  %v771_v48 = vadd.f32 %v3700_v20, %v3733_v56 }
 0x124   :  { %v2903_v21 = vpop.eup %2902  ;;  %2922 = vrcp.f32 %v989_v8  ;;  %v1024_v22 = vadd.f32 1.0, %v2901_v13  ;;  %v685_v26 = vpop.f32.mrb[25].mxu1  ;;  %v3806_v16 = vadd.f32 %v3700_v20, %v525_v19  ;;  %v2540_v58 = vmul.f32 -1.442695, %v740_v27 }
 0x125   :  { %v2905_v28 = vpop.eup %2904  ;;  %2924 = vrcp.f32 %v992_v14  ;;  %v1023_v32 = vadd.f32 1.0, %v2903_v21  ;;  %v3811_v35 = vadd.f32 %v3700_v20, %v685_v26  ;;  %1355 = vperm.xlu1 %2831, %v3766_v31   ;;  %v2734_v43 = vpop.f32.mrb[26].mxu0  ;;  %v2571_v34 = vmul.f32 -1.442695, %v771_v48 }
 0x126   :  { %v2907_v36 = vpop.eup %2906  ;;  %2926 = vrcp.f32 %v1024_v22  ;;  %v991_v37 = vadd.f32 1.0, %v2905_v28  ;;  %v3821_v49 = vadd.f32 %v2734_v43, %v3700_v20  ;;  %v2782_v50 = vpop.f32.mrb[26].mxu1  ;;  %v2539_v13 = vmul.f32 -1.442695, %v739_v42 }
 0x127   :  { %v2909_v44 = vpop.eup %2908  ;;  %2928 = vrcp.f32 %v1023_v32  ;;  %v994_v47 = vadd.f32 1.0, %v2907_v36  ;;  %v535_v51 = vpop.f32.mrb[27].mxu0  ;;  %v3824_v52 = vadd.f32 %v2782_v50, %v3700_v20  ;;  %v2574_v21 = vmul.f32 -1.442695, %v3742_v6 }
 0x128   :  { %v2911_v54 = vpop.eup %2910  ;;  %2930 = vrcp.f32 %v991_v37  ;;  %v1026_v31 = vadd.f32 1.0, %v2909_v44  ;;  %v695_v55 = vpop.f32.mrb[27].mxu1  ;;  %v3827_v53 = vadd.f32 %v3700_v20, %v535_v51  ;;  %v2573_v28 = vmul.f32 -1.442695, %v3746_v11 }
 0x129   :  { %v2913_v57 = vpop.eup %2912  ;;  %2932 = vrcp.f32 %v994_v47  ;;  %1370 = vperm.xlu0 %2830, %v2911_v54   ;;  %v3830_v56 = vadd.f32 %v3700_v20, %v695_v55  ;;  %1210 = vperm.xlu1 %2831, %v3768_v33   ;;  %v2737_v62 = vpop.f32.mrb[28].mxu0  ;;  %v2544_v11 = vmul.f32 -1.442695, %v3755_v23  ;;  %v2576_v47 = vmul.f32 -1.442695, %v3758_v24 }
 0x12a   :  { %v2915_v59 = vpop.eup %2914  ;;  %2934 = vrcp.f32 %v1026_v31  ;;  %v2785_v63 = vpop.f32.mrb[28].mxu1  ;;  %v3834_v3 = vadd.f32 %v2737_v62, %v3700_v20 }
 0x12b   :  { %v2917_v0 = vpop.eup %2916  ;;  %2936 = vpow2.f32 %v2569_v15  ;;  %v3837_v4 = vadd.f32 %v2785_v63, %v3700_v20  ;;  %v705_v7 = vpop.f32.mrb[29].mxu1  ;;  %v2542_v15 = vmul.f32 -1.442695, %v3739_v5 }
 0x12c   :  { %v545_v8 = vpop.f32.mrb[29].mxu0  ;;  %v2919_v10 = vpop.eup %2918  ;;  %2938 = vpow2.f32 %v2537_v9  ;;  %v3840_v14 = vadd.f32 %v3700_v20, %v705_v7 }
 0x12d   :  { %v3843_v33 = vadd.f32 %v3700_v20, %v545_v8  ;;  %v2921_v18 = vpop.eup %2920  ;;  %2940 = vpow2.f32 %v2540_v58  ;;  %1205 = vperm.xlu0 %2830, %v2913_v57   ;;  %1365 = vperm.xlu1 %2831, %v2915_v59   ;;  %v2740_v22 = vpop.f32.mrb[30].mxu0 }
 0x12e   :  { %v2923_v19 = vpop.eup %2922  ;;  %2942 = vpow2.f32 %v2572_v61  ;;  %v2788_v26 = vpop.f32.mrb[30].mxu1  ;;  %v3849_v32 = vadd.f32 %v2740_v22, %v3700_v20  ;;  %v2543_v22 = vmul.f32 -1.442695, %v3764_v30 }
 0x12f   :  { %v2925_v9 = vpop.eup %2924  ;;  %2944 = vpow2.f32 %v2571_v34  ;;  %v3852_v27 = vadd.f32 %v2788_v26, %v3700_v20  ;;  %v555_v36 = vpop.f32.mrb[31].mxu0 }
 0x130   :  { %v715_v37 = vpop.f32.mrb[31].mxu1  ;;  %v2927_v5 = vpop.eup %2926  ;;  %2946 = vpow2.f32 %v2539_v13  ;;  %v3856_v6 = vadd.f32 %v3700_v20, %v555_v36  ;;  %v2578_v36 = vmul.f32 -1.442695, %v3774_v40  ;;  %v2579_v40 = vmul.f32 -1.442695, %v3796_v39 }
 0x131   :  { %v3859_v42 = vadd.f32 %v3700_v20, %v715_v37  ;;  %v2929_v43 = vpop.eup %2928  ;;  %1380 = vperm.xlu0 %2830, %v2919_v10   ;;  %2948 = vpow2.f32 %v2542_v15  ;;  %1220 = vperm.xlu1 %2831, %v2917_v0   ;;  %v2582_v39 = vmul.f32 -1.442695, %v3803_v25 }
 0x132   :  { %v2931_v44 = vpop.eup %2930  ;;  %2950 = vpow2.f32 %v2574_v21 }
 0x133   :  { %v2933_v48 = vpop.eup %2932  ;;  %2952 = vpow2.f32 %v2573_v28 }
 0x134   :  { %v2935_v50 = vpop.eup %2934  ;;  %2954 = vpow2.f32 %v2541_v41 }
 0x135   :  { %v2937_v51 = vpop.eup %2936  ;;  %1215 = vperm.xlu0 %2830, %v2923_v19   ;;  %2956 = vpow2.f32 %v2544_v11  ;;  %1375 = vperm.xlu1 %2831, %v2921_v18   ;;  %v2548_v11 = vmul.f32 -1.442695, %v3787_v60 }
 0x136   :  { %v2939_v20 = vpop.eup %2938  ;;  %v1025_v54 = vadd.f32 1.0, %v2937_v51  ;;  %2958 = vpow2.f32 %v2576_v47 }
 0x137   :  { %v2941_v31 = vpop.eup %2940  ;;  %v993_v23 = vadd.f32 1.0, %v2939_v20  ;;  %2960 = vpow2.f32 %v2575_v12 }
 0x138   :  { %v2943_v55 = vpop.eup %2942  ;;  %v996_v57 = vadd.f32 1.0, %v2941_v31  ;;  %2962 = vrcp.f32 %v1025_v54 }
 0x139   :  { %v2945_v58 = vpop.eup %2944  ;;  %v1028_v24 = vadd.f32 1.0, %v2943_v55  ;;  %1390 = vperm.xlu0 %2830, %v2927_v5   ;;  %2964 = vrcp.f32 %v993_v23  ;;  %1230 = vperm.xlu1 %2831, %v2925_v9   ;;  %v2546_v9 = vmul.f32 -1.442695, %v3771_v38  ;;  %v2577_v5 = vmul.f32 -1.442695, %v3777_v45 }
 0x13a   :  { %v2947_v59 = vpop.eup %2946  ;;  %v1027_v61 = vadd.f32 1.0, %v2945_v58  ;;  %2966 = vrcp.f32 %v996_v57  ;;  %v2580_v38 = vmul.f32 -1.442695, %v3790_v1  ;;  %v2547_v45 = vmul.f32 -1.442695, %v3793_v2 }
 0x13b   :  { %v2949_v29 = vpop.eup %2948  ;;  %v995_v62 = vadd.f32 1.0, %v2947_v59  ;;  %2968 = vrcp.f32 %v1028_v24  ;;  %v2581_v2 = vmul.f32 -1.442695, %v3811_v35  ;;  %v2549_v24 = vmul.f32 -1.442695, %v3806_v16 }
 0x13c   :  { %v2951_v63 = vpop.eup %2950  ;;  %v998_v0 = vadd.f32 1.0, %v2949_v29  ;;  %2970 = vrcp.f32 %v1027_v61 }
 0x13d   :  { %v2953_v34 = vpop.eup %2952  ;;  %v1030_v7 = vadd.f32 1.0, %v2951_v63  ;;  %1225 = vperm.xlu0 %2830, %v2931_v44   ;;  %2972 = vrcp.f32 %v995_v62  ;;  %1385 = vperm.xlu1 %2831, %v2929_v43   ;;  %v2545_v43 = vmul.f32 -1.442695, %v3780_v46  ;;  %v2550_v46 = vmul.f32 -1.442695, %v3800_v17 }
 0x13e   :  { %v2955_v8 = vpop.eup %2954  ;;  %v1029_v10 = vadd.f32 1.0, %v2953_v34  ;;  %2974 = vrcp.f32 %v998_v0 }
 0x13f   :  { %v2957_v13 = vpop.eup %2956  ;;  %v997_v18 = vadd.f32 1.0, %v2955_v8  ;;  %2976 = vrcp.f32 %v1030_v7 }
 0x140   :  { %v2959_v15 = vpop.eup %2958  ;;  %v1000_v19 = vadd.f32 1.0, %v2957_v13  ;;  %2978 = vrcp.f32 %v1029_v10 }
 0x141   :  { %v1032_v21 = vadd.f32 1.0, %v2959_v15  ;;  %1400 = vperm.xlu0 %2830, %v2935_v50   ;;  %v2961_v26 = vpop.eup %2960  ;;  %2980 = vrcp.f32 %v997_v18  ;;  %1240 = vperm.xlu1 %2831, %v2933_v48   ;;  %v2552_v15 = vmul.f32 -1.442695, %v3821_v49  ;;  %v2586_v49 = vmul.f32 -1.442695, %v3837_v4 }
 0x142   :  { %v2963_v28 = vpop.eup %2962  ;;  %2982 = vrcp.f32 %v1000_v19  ;;  %v1031_v51 = vadd.f32 1.0, %v2961_v26  ;;  %v2583_v26 = vmul.f32 -1.442695, %v3830_v56 }
 0x143   :  { %v2965_v37 = vpop.eup %2964  ;;  %2984 = vrcp.f32 %v1032_v21  ;;  %v2584_v21 = vmul.f32 -1.442695, %v3824_v52 }
 0x144   :  { %v2967_v41 = vpop.eup %2966  ;;  %2986 = vpow2.f32 %v2543_v22 }
 0x145   :  { %1235 = vperm.xlu0 %2830, %v2965_v37   ;;  %v2969_v30 = vpop.eup %2968  ;;  %2988 = vpow2.f32 %v2546_v9  ;;  %1395 = vperm.xlu1 %2831, %v2963_v28   ;;  %v2551_v28 = vmul.f32 -1.442695, %v3827_v53  ;;  %v2554_v37 = vmul.f32 -1.442695, %v3834_v3  ;;  %v2553_v3 = vmul.f32 -1.442695, %v3843_v33 }
 0x146   :  { %v2971_v44 = vpop.eup %2970  ;;  %2990 = vpow2.f32 %v2578_v36 }
 0x147   :  { %v2973_v47 = vpop.eup %2972  ;;  %2992 = vpow2.f32 %v2577_v5 }
 0x148   :  { %v2975_v48 = vpop.eup %2974  ;;  %2994 = vpow2.f32 %v2545_v43 }
 0x149   :  { %1410 = vperm.xlu0 %2830, %v2969_v30   ;;  %v2977_v50 = vpop.eup %2976  ;;  %1250 = vperm.xlu1 %2831, %v2967_v41   ;;  %2996 = vpow2.f32 %v2548_v11  ;;  %v2585_v11 = vmul.f32 -1.442695, %v3840_v14 }
 0x14a   :  { %v2979_v12 = vpop.eup %2978  ;;  %2998 = vpow2.f32 %v2580_v38  ;;  %v2555_v38 = vmul.f32 -1.442695, %v3856_v6  ;;  %v2556_v6 = vmul.f32 -1.442695, %v3849_v32 }
 0x14b   :  { %v2981_v60 = vpop.eup %2980  ;;  %3000 = vpow2.f32 %v2579_v40  ;;  %v2587_v40 = vmul.f32 -1.442695, %v3859_v42  ;;  %v2588_v42 = vmul.f32 -1.442695, %v3852_v27 }
 0x14c   :  { %v2983_v1 = vpop.eup %2982  ;;  %3002 = vpow2.f32 %v2547_v45 }
 0x14d   :  { %1245 = vperm.xlu0 %2830, %v2973_v47   ;;  %v2985_v20 = vpop.eup %2984  ;;  %1405 = vperm.xlu1 %2831, %v2971_v44   ;;  %3004 = vpow2.f32 %v2550_v46 }
 0x14e   :  { %v2987_v54 = vpop.eup %2986  ;;  %3006 = vrcp.f32 %v1031_v51 }
 0x14f   :  { %v2989_v31 = vpop.eup %2988  ;;  %v999_v23 = vadd.f32 1.0, %v2987_v54  ;;  %3008 = vpow2.f32 %v2582_v39 }
 0x150   :  { %v2991_v17 = vpop.eup %2990  ;;  %v1002_v55 = vadd.f32 1.0, %v2989_v31 }
 0x151   :  { %1260 = vperm.xlu0 %2830, %v2975_v48   ;;  %v2993_v57 = vpop.eup %2992  ;;  %3010 = vrcp.f32 %v999_v23  ;;  %v1034_v58 = vadd.f32 1.0, %v2991_v17  ;;  %1420 = vperm.xlu1 %2831, %v2977_v50  }
 0x152   :  { %v2995_v25 = vpop.eup %2994  ;;  %3012 = vpow2.f32 %v2581_v2  ;;  %v1033_v61 = vadd.f32 1.0, %v2993_v57 }
 0x153   :  { %v2997_v59 = vpop.eup %2996  ;;  %3014 = vrcp.f32 %v1002_v55  ;;  %v1001_v35 = vadd.f32 1.0, %v2995_v25 }
 0x154   :  { %v2999_v29 = vpop.eup %2998  ;;  %3016 = vrcp.f32 %v1034_v58  ;;  %v1004_v63 = vadd.f32 1.0, %v2997_v59 }
 0x155   :  { %1255 = vperm.xlu0 %2830, %v2981_v60   ;;  %v3001_v62 = vpop.eup %3000  ;;  %3018 = vpow2.f32 %v2549_v24  ;;  %1415 = vperm.xlu1 %2831, %v2979_v12   ;;  %v1036_v34 = vadd.f32 1.0, %v2999_v29 }
 0x156   :  { %v3003_v0 = vpop.eup %3002  ;;  %3020 = vrcp.f32 %v1033_v61  ;;  %v1035_v8 = vadd.f32 1.0, %v3001_v62 }
 0x157   :  { %v3005_v7 = vpop.eup %3004  ;;  %3022 = vrcp.f32 %v1001_v35  ;;  %v1003_v16 = vadd.f32 1.0, %v3003_v0 }
 0x158   :  { %v3007_v10 = vpop.eup %3006  ;;  %3024 = vrcp.f32 %v1004_v63  ;;  %v1006_v13 = vadd.f32 1.0, %v3005_v7 }
 0x159   :  { %1270 = vperm.xlu0 %2830, %v2983_v1   ;;  %1430 = vperm.xlu1 %2831, %v2985_v20   ;;  %v3009_v18 = vpop.eup %3008  ;;  %3026 = vrcp.f32 %v1036_v34 }
 0x15a   :  { %3028 = vrcp.f32 %v1035_v8  ;;  %v1038_v41 = vadd.f32 1.0, %v3009_v18 }
 0x15b   :  { %v3011_v19 = vpop.eup %3010  ;;  %3030 = vrcp.f32 %v1003_v16 }
 0x15c   :  { %v3013_v22 = vpop.eup %3012  ;;  %3032 = vrcp.f32 %v1006_v13 }
 0x15d   :  { %1265 = vperm.xlu0 %2830, %v3011_v19   ;;  %v3015_v9 = vpop.eup %3014  ;;  %1425 = vperm.xlu1 %2831, %v3007_v10   ;;  %3034 = vpow2.f32 %v2552_v15  ;;  %v1037_v43 = vadd.f32 1.0, %v3013_v22 }
 0x15e   :  { %v3017_v36 = vpop.eup %3016  ;;  %3036 = vpow2.f32 %v2584_v21  ;;  %v3892_v21 = vld [vmem:[%s5123_s3] ss:$0 sm:$0xff] }
 0x15f   :  { %v3019_v5 = vpop.eup %3018  ;;  %3038 = vpow2.f32 %v2583_v26 }
 0x160   :  { %v3021_v52 = vpop.eup %3020  ;;  %3040 = vpow2.f32 %v2551_v28  ;;  %v1005_v30 = vadd.f32 1.0, %v3019_v5 }
 0x161   :  { %1280 = vperm.xlu0 %2830, %v3015_v9   ;;  %1440 = vperm.xlu1 %2831, %v3017_v36   ;;  %v3023_v56 = vpop.eup %3022  ;;  %3042 = vpow2.f32 %v2554_v37 }
 0x162   :  { %v3025_v53 = vpop.eup %3024  ;;  %3044 = vpow2.f32 %v2586_v49 }
 0x163   :  { %v3027_v44 = vpop.eup %3026  ;;  %3046 = vrcp.f32 %v1038_v41 }
 0x164   :  { %v3029_v4 = vpop.eup %3028  ;;  %3048 = vrcp.f32 %v1037_v43 }
 0x165   :  { %1275 = vperm.xlu0 %2830, %v3023_v56   ;;  %1435 = vperm.xlu1 %2831, %v3021_v52   ;;  %v3031_v47 = vpop.eup %3030  ;;  %3050 = vrcp.f32 %v1005_v30 }
 0x166   :  { %v3033_v48 = vpop.eup %3032  ;;  %3052 = vpow2.f32 %v2585_v11 }
 0x167   :  { %v3035_v45 = vpop.eup %3034  ;;  %3054 = vpow2.f32 %v2553_v3 }
 0x168   :  { %v3037_v14 = vpop.eup %3036  ;;  %v1008_v50 = vadd.f32 1.0, %v3035_v45  ;;  %3056 = vpow2.f32 %v2555_v38 }
 0x169   :  { %1290 = vperm.xlu0 %2830, %v3025_v53   ;;  %1450 = vperm.xlu1 %2831, %v3027_v44   ;;  %v3039_v46 = vpop.eup %3038  ;;  %v1040_v33 = vadd.f32 1.0, %v3037_v14  ;;  %3058 = vpow2.f32 %v2587_v40 }
 0x16a   :  { %v3041_v12 = vpop.eup %3040  ;;  %3060 = vrcp.f32 %v1008_v50  ;;  %v1039_v20 = vadd.f32 1.0, %v3039_v46 }
 0x16b   :  { %v3043_v60 = vpop.eup %3042  ;;  %3062 = vrcp.f32 %v1040_v33  ;;  %v1007_v1 = vadd.f32 1.0, %v3041_v12 }
 0x16c   :  { %v3045_v51 = vpop.eup %3044  ;;  %v1010_v2 = vadd.f32 1.0, %v3043_v60  ;;  %3064 = vpow2.f32 %v2556_v6 }
 0x16d   :  { %1285 = vperm.xlu0 %2830, %v3031_v47   ;;  %1445 = vperm.xlu1 %2831, %v3029_v4   ;;  %v3047_v39 = vpop.eup %3046  ;;  %v1042_v23 = vadd.f32 1.0, %v3045_v51  ;;  %3066 = vpow2.f32 %v2588_v42 }
 0x16e   :  { %v3049_v54 = vpop.eup %3048  ;;  %3068 = vrcp.f32 %v1007_v1 }
 0x16f   :  { %v3051_v31 = vpop.eup %3050  ;;  %3070 = vrcp.f32 %v1039_v20 }
 0x170   :  { %v3053_v17 = vpop.eup %3052  ;;  %3072 = vrcp.f32 %v1010_v2 }
 0x171   :  { %1300 = vperm.xlu0 %2830, %v3033_v48   ;;  %1460 = vperm.xlu1 %2831, %v3047_v39   ;;  %v3055_v32 = vpop.eup %3054  ;;  %3074 = vrcp.f32 %v1042_v23  ;;  %v1041_v25 = vadd.f32 1.0, %v3053_v17 }
 0x172   :  { %v3057_v55 = vpop.eup %3056  ;;  %v1009_v58 = vadd.f32 1.0, %v3055_v32 }
 0x173   :  { %v3059_v27 = vpop.eup %3058  ;;  %v1011_v59 = vadd.f32 1.0, %v3057_v55 }
 0x174   :  { %v3061_v57 = vpop.eup %3060  ;;  %v1043_v61 = vadd.f32 1.0, %v3059_v27  ;;  %3076 = vrcp.f32 %v1009_v58 }
 0x175   :  { %1295 = vperm.xlu0 %2830, %v3051_v31   ;;  %1455 = vperm.xlu1 %2831, %v3049_v54   ;;  %v3063_v24 = vpop.eup %3062  ;;  %3078 = vrcp.f32 %v1041_v25 }
 0x176   :  { %v3065_v29 = vpop.eup %3064  ;;  %3080 = vrcp.f32 %v1011_v59 }
 0x177   :  { %v3067_v35 = vpop.eup %3066  ;;  %3082 = vrcp.f32 %v1043_v61  ;;  %v1012_v34 = vadd.f32 1.0, %v3065_v29 }
 0x178   :  { %v3069_v62 = vpop.eup %3068  ;;  %v1044_v8 = vadd.f32 1.0, %v3067_v35 }
 0x179   :  { %1310 = vperm.xlu0 %2830, %v3061_v57   ;;  %1470 = vperm.xlu1 %2831, %v3063_v24   ;;  %v3071_v63 = vpop.eup %3070  ;;  %3084 = vrcp.f32 %v1012_v34 }
 0x17a   :  { %v3073_v0 = vpop.eup %3072  ;;  %3086 = vrcp.f32 %v1044_v8 }
 0x17b   :  { %v3075_v7 = vpop.eup %3074 }
 0x17d   :  { %1305 = vperm.xlu0 %2830, %v3069_v62   ;;  %1465 = vperm.xlu1 %2831, %v3071_v63  }
 0x17e   :  { %v3077_v16 = vpop.eup %3076 }
 0x17f   :  { %v3079_v10 = vpop.eup %3078 }
 0x180   :  { %v3081_v13 = vpop.eup %3080 }
 0x181   :  { %1320 = vperm.xlu0 %2830, %v3073_v0   ;;  %1480 = vperm.xlu1 %2831, %v3075_v7   ;;  %v3083_v18 = vpop.eup %3082 }
 0x183   :  { %v3085_v15 = vpop.eup %3084 }
 0x184   :  { %v3087_v19 = vpop.eup %3086 }
 0x185   :  { %1315 = vperm.xlu0 %2830, %v3077_v16   ;;  %1475 = vperm.xlu1 %2831, %v3079_v10  }
 0x189   :  { %1325 = vperm.xlu0 %2830, %v3081_v13   ;;  %1485 = vperm.xlu1 %2831, %v3083_v18  }
 0x18d   :  { %1330 = vperm.xlu0 %2830, %v3085_v15   ;;  %1490 = vperm.xlu1 %2831, %v3087_v19   ;;  %v1181_v22 = vpop.permute.xlu0 %1180 }
 0x18e   :  { %v1500_v26 = vmul.f32 %v3892_v21, %v1181_v22 }
 0x190   :  { %v1336_v9 = vpop.permute.xlu1 %1335  ;;  %v1566_v37 = vsel %vm142_vm0, %v1500_v26, -inf }
 0x191   :  { %v1341_v28 = vpop.permute.xlu0 %1340  ;;  %v1531_v5 = vmul.f32 %v3892_v21, %v1336_v9 }
 0x192   :  { %v1532_v36 = vmul.f32 %v3892_v21, %v1341_v28 }
 0x193   :  { %v1564_v11 = vsel %vm142_vm0, %v1531_v5, -inf }
 0x194   :  { %v1567_v49 = vsel %vm142_vm0, %v1532_v36, -inf  ;;  %v1191_v41 = vpop.permute.xlu1 %1190 }
 0x195   :  { %v1568_v52 = vmax.f32 %v1566_v37, %v1567_v49  ;;  %v1176_v43 = vpop.permute.xlu0 %1175  ;;  %v1502_v44 = vmul.f32 %v3892_v21, %v1191_v41 }
 0x196   :  { %v1499_v56 = vmul.f32 %v3892_v21, %v1176_v43 }
 0x197   :  { %v1660_v30 = vsub.f32 %v1500_v26, %v1568_v52  ;;  %v1692_v53 = vsub.f32 %v1532_v36, %v1568_v52  ;;  %v1572_v33 = vsel %vm142_vm0, %v1502_v44, -inf }
 0x198   :  { %v1563_v3 = vsel %vm142_vm0, %v1499_v56, -inf  ;;  %v1186_v4 = vpop.permute.xlu1 %1185 }
 0x199   :  { %v1725_v38 = vmul.f32 1.442695, %v1660_v30  ;;  %v1789_v47 = vmul.f32 1.442695, %v1692_v53  ;;  %v1565_v40 = vmax.f32 %v1563_v3, %v1564_v11  ;;  %v1351_v48 = vpop.permute.xlu0 %1350  ;;  %v1501_v45 = vmul.f32 %v3892_v21, %v1186_v4 }
 0x19a   :  { %v1534_v14 = vmul.f32 %v3892_v21, %v1351_v48 }
 0x19b   :  { %3088 = vpow2.f32 %v1725_v38  ;;  %v1659_v50 = vsub.f32 %v1499_v56, %v1565_v40  ;;  %v1691_v46 = vsub.f32 %v1531_v5, %v1565_v40  ;;  %v1569_v20 = vsel %vm142_vm0, %v1501_v45, -inf }
 0x19c   :  { %3090 = vpow2.f32 %v1789_v47  ;;  %v1573_v12 = vsel %vm142_vm0, %v1534_v14, -inf  ;;  %v1346_v6 = vpop.permute.xlu1 %1345 }
 0x19d   :  { %v1723_v60 = vmul.f32 1.442695, %v1659_v50  ;;  %v1787_v42 = vmul.f32 1.442695, %v1691_v46  ;;  %v1574_v51 = vmax.f32 %v1572_v33, %v1573_v12  ;;  %v1533_v1 = vmul.f32 %v3892_v21, %v1346_v6  ;;  %v1361_v39 = vpop.permute.xlu0 %1360 }
 0x19e   :  { %v1536_v54 = vmul.f32 %v3892_v21, %v1361_v39 }
 0x19f   :  { %3092 = vpow2.f32 %v1723_v60  ;;  %v1662_v2 = vsub.f32 %v1502_v44, %v1574_v51  ;;  %v1694_v31 = vsub.f32 %v1534_v14, %v1574_v51  ;;  %v1570_v23 = vsel %vm142_vm0, %v1533_v1, -inf }
 0x1a0   :  { %3094 = vpow2.f32 %v1787_v42  ;;  %v1571_v17 = vmax.f32 %v1569_v20, %v1570_v23  ;;  %v1201_v32 = vpop.permute.xlu1 %1200  ;;  %v1579_v57 = vsel %vm142_vm0, %v1536_v54, -inf }
 0x1a1   :  { %v1729_v55 = vmul.f32 1.442695, %v1662_v2  ;;  %v1793_v27 = vmul.f32 1.442695, %v1694_v31  ;;  %v1504_v58 = vmul.f32 %v3892_v21, %v1201_v32  ;;  %v1196_v24 = vpop.permute.xlu0 %1195 }
 0x1a2   :  { %v1661_v25 = vsub.f32 %v1501_v45, %v1571_v17  ;;  %v1693_v59 = vsub.f32 %v1533_v1, %v1571_v17  ;;  %v1503_v61 = vmul.f32 %v3892_v21, %v1196_v24 }
 0x1a3   :  { %3096 = vpow2.f32 %v1729_v55  ;;  %v1578_v29 = vsel %vm142_vm0, %v1504_v58, -inf }
 0x1a4   :  { %3098 = vpow2.f32 %v1793_v27  ;;  %v1727_v35 = vmul.f32 1.442695, %v1661_v25  ;;  %v1791_v62 = vmul.f32 1.442695, %v1693_v59  ;;  %v1580_v63 = vmax.f32 %v1578_v29, %v1579_v57  ;;  %v1356_v0 = vpop.permute.xlu1 %1355 }
 0x1a5   :  { %v3915_v34 = vpop.eup %3088  ;;  %v1575_v7 = vsel %vm142_vm0, %v1503_v61, -inf  ;;  %v1535_v8 = vmul.f32 %v3892_v21, %v1356_v0 }
 0x1a6   :  { %v3919_v16 = vpop.eup %3090  ;;  %v1854_v10 = vsel %vm142_vm0, %v3915_v34, 0.0  ;;  %3100 = vpow2.f32 %v1727_v35  ;;  %v1664_v13 = vsub.f32 %v1504_v58, %v1580_v63  ;;  %v1696_v18 = vsub.f32 %v1536_v54, %v1580_v63 }
 0x1a7   :  { %v1855_v15 = vsel %vm142_vm0, %v3919_v16, 0.0  ;;  %3102 = vpow2.f32 %v1791_v62  ;;  %v1576_v19 = vsel %vm142_vm0, %v1535_v8, -inf }
 0x1a8   :  { %v1371_v22 = vpop.permute.xlu0 %1370  ;;  %v1856_v26 = vadd.f32 %v1855_v15, %v1854_v10  ;;  %v1733_v9 = vmul.f32 1.442695, %v1664_v13  ;;  %v1797_v28 = vmul.f32 1.442695, %v1696_v18  ;;  %v1577_v36 = vmax.f32 %v1575_v7, %v1576_v19  ;;  %v1211_v37 = vpop.permute.xlu1 %1210 }
 0x1a9   :  { %v3926_v5 = vpop.eup %3092  ;;  %v1538_v49 = vmul.f32 %v3892_v21, %v1371_v22  ;;  %v1506_v41 = vmul.f32 %v3892_v21, %v1211_v37 }
 0x1aa   :  { %v3930_v52 = vpop.eup %3094  ;;  %3104 = vrcp.f32 %v1856_v26  ;;  %v1851_v43 = vsel %vm142_vm0, %v3926_v5, 0.0  ;;  %v1663_v56 = vsub.f32 %v1503_v61, %v1577_v36  ;;  %v1695_v30 = vsub.f32 %v1535_v8, %v1577_v36 }
 0x1ab   :  { %v1852_v53 = vsel %vm142_vm0, %v3930_v52, 0.0  ;;  %3106 = vpow2.f32 %v1733_v9  ;;  %v1585_v11 = vsel %vm142_vm0, %v1538_v49, -inf  ;;  %v1584_v44 = vsel %vm142_vm0, %v1506_v41, -inf }
 0x1ac   :  { %v1206_v3 = vpop.permute.xlu0 %1205  ;;  %v3938_v4 = vadd.f32 %v1852_v53, %v1851_v43  ;;  %3108 = vpow2.f32 %v1797_v28  ;;  %v1731_v38 = vmul.f32 1.442695, %v1663_v56  ;;  %v1795_v47 = vmul.f32 1.442695, %v1695_v30  ;;  %v1366_v40 = vpop.permute.xlu1 %1365 }
 0x1ad   :  { %v3940_v48 = vpop.eup %3096  ;;  %v1586_v45 = vmax.f32 %v1584_v44, %v1585_v11  ;;  %v1505_v14 = vmul.f32 %v3892_v21, %v1206_v3  ;;  %v1537_v50 = vmul.f32 %v3892_v21, %v1366_v40 }
 0x1ae   :  { %v3944_v46 = vpop.eup %3098  ;;  %3110 = vrcp.f32 %v3938_v4  ;;  %v1860_v33 = vsel %vm142_vm0, %v3940_v48, 0.0 }
 0x1af   :  { %v1861_v12 = vsel %vm142_vm0, %v3944_v46, 0.0  ;;  %3112 = vpow2.f32 %v1731_v38  ;;  %v1666_v6 = vsub.f32 %v1506_v41, %v1586_v45  ;;  %v1698_v60 = vsub.f32 %v1538_v49, %v1586_v45 }
 0x1b0   :  { %v1381_v42 = vpop.permute.xlu0 %1380  ;;  %v3951_v51 = vpop.eup %3100  ;;  %v3953_v1 = vadd.f32 %v1861_v12, %v1860_v33  ;;  %3114 = vpow2.f32 %v1795_v47  ;;  %v1581_v39 = vsel %vm142_vm0, %v1505_v14, -inf  ;;  %v1582_v20 = vsel %vm142_vm0, %v1537_v50, -inf }
 0x1b1   :  { %v1221_v54 = vpop.permute.xlu1 %1220  ;;  %v3957_v2 = vpop.eup %3102  ;;  %v1857_v31 = vsel %vm142_vm0, %v3951_v51, 0.0  ;;  %v1737_v23 = vmul.f32 1.442695, %v1666_v6  ;;  %v1801_v17 = vmul.f32 1.442695, %v1698_v60  ;;  %v1583_v32 = vmax.f32 %v1581_v39, %v1582_v20  ;;  %v3281_v39 = vld [vmem:[%s5120_s0 + $0x108] sm:$0xff] }
 0x1b2   :  { %3116 = vrcp.f32 %v3953_v1  ;;  %v1858_v55 = vsel %vm142_vm0, %v3957_v2, 0.0  ;;  %v1540_v27 = vmul.f32 %v3892_v21, %v1381_v42  ;;  %v1508_v57 = vmul.f32 %v3892_v21, %v1221_v54 }
 0x1b3   :  { %v3966_v58 = vadd.f32 %v1858_v55, %v1857_v31  ;;  %3118 = vpow2.f32 %v1737_v23  ;;  %v1665_v24 = vsub.f32 %v1505_v14, %v1583_v32  ;;  %v1697_v25 = vsub.f32 %v1537_v50, %v1583_v32 }
 0x1b4   :  { %v1216_v59 = vpop.permute.xlu0 %1215  ;;  %v3105_v61 = vpop.eup %3104  ;;  %3120 = vpow2.f32 %v1801_v17  ;;  %v1591_v29 = vsel %vm142_vm0, %v1540_v27, -inf  ;;  %v1590_v35 = vsel %vm142_vm0, %v1508_v57, -inf }
 0x1b5   :  { %v3971_v62 = vmul.f32 %v3892_v21, %v1216_v59  ;;  %v1376_v63 = vpop.permute.xlu1 %1375  ;;  %v3973_v0 = vpop.eup %3106  ;;  %v1980_v7 = vmul.f32 %v3105_v61, %v1856_v26  ;;  %3122 = vrcp.f32 %v3966_v58  ;;  %v1735_v8 = vmul.f32 1.442695, %v1665_v24 }
 0x1b6   :  { %v1799_v10 = vmul.f32 1.442695, %v1697_v25  ;;  %v3976_v13 = vpop.eup %3108  ;;  %v1866_v18 = vsel %vm142_vm0, %v3973_v0, 0.0  ;;  %v1592_v15 = vmax.f32 %v1590_v35, %v1591_v29  ;;  %v3981_v19 = vmul.f32 %v3892_v21, %v1376_v63 }
 0x1b7   :  { %v2012_v22 = vsub.f32 2.0, %v1980_v7  ;;  %v1867_v9 = vsel %vm142_vm0, %v3976_v13, 0.0  ;;  %3124 = vpow2.f32 %v1735_v8  ;;  %v1587_v26 = vsel %vm142_vm0, %v3971_v62, -inf }
 0x1b8   :  { %v1391_v28 = vpop.permute.xlu0 %1390  ;;  %v3111_v36 = vpop.eup %3110  ;;  %v3987_v37 = vadd.f32 %v1867_v9, %v1866_v18  ;;  %3126 = vpow2.f32 %v1799_v10  ;;  %v1668_v49 = vsub.f32 %v1508_v57, %v1592_v15  ;;  %v1700_v41 = vsub.f32 %v1540_v27, %v1592_v15 }
 0x1b9   :  { %v3989_v43 = vpop.eup %3112  ;;  %v2044_v56 = vmul.f32 %v3105_v61, %v2012_v22  ;;  %v1979_v30 = vmul.f32 %v3111_v36, %v3938_v4  ;;  %v1588_v53 = vsel %vm142_vm0, %v3981_v19, -inf  ;;  %v3995_v11 = vmul.f32 %v3892_v21, %v1391_v28  ;;  %v1231_v60 = vpop.permute.xlu1 %1230 }
 0x1ba   :  { %v3997_v44 = vpop.eup %3114  ;;  %3128 = vrcp.f32 %v3987_v37  ;;  %v1863_v3 = vsel %vm142_vm0, %v3989_v43, 0.0  ;;  %v1741_v38 = vmul.f32 1.442695, %v1668_v49  ;;  %v1805_v47 = vmul.f32 1.442695, %v1700_v41 }
 0x1bb   :  { %v2076_v40 = vmul.f32 %v3915_v34, %v2044_v56  ;;  %v2108_v45 = vmul.f32 %v3919_v16, %v2044_v56  ;;  %v2011_v4 = vsub.f32 2.0, %v1979_v30  ;;  %v1864_v14 = vsel %vm142_vm0, %v3997_v44, 0.0  ;;  %v3280_v34 = vld [vmem:[%s5120_s0 + $0x8] sm:$0xff] }
 0x1bc   :  { %v3117_v50 = vpop.eup %3116  ;;  %v4006_v33 = vadd.f32 %v1864_v14, %v1863_v3  ;;  %3130 = vpow2.f32 %v1741_v38  ;;  %v1589_v12 = vmax.f32 %v1587_v26, %v1588_v53  ;;  %v4010_v6 = vsel %vm142_vm0, %v3995_v11, -inf  ;;  %v1226_v8 = vpop.permute.xlu0 %1225 }
 0x1bd   :  { %v4012_v42 = vpop.eup %3118  ;;  %2140 = vst.msk [vmem:[%s5125_s5 + $0x8] sm:$0xff] %vm142_vm0, %v2076_v40  ;;  %2172 = vst.msk [vmem:[%s5125_s5 + $0x108] sm:$0xff] %vm142_vm0, %v2108_v45  ;;  %v2205_v16 = vmul.f32 %v3280_v34, %v2076_v40  ;;  %v2237_v20 = vmul.f32 %v3281_v39, %v2108_v45  ;;  %v2043_v54 = vmul.f32 %v3111_v36, %v2011_v4  ;;  %v1386_v9 = vpop.permute.xlu1 %1385 }
 0x1be   :  { %v1982_v31 = vmul.f32 %v3117_v50, %v3953_v1  ;;  %v4029_v23 = vpop.eup %3120  ;;  %3132 = vrcp.f32 %v4006_v33  ;;  %v1872_v17 = vsel %vm142_vm0, %v4012_v42, 0.0  ;;  %v1667_v32 = vsub.f32 %v3971_v62, %v1589_v12 }
 0x1bf   :  { %v1699_v55 = vsub.f32 %v3981_v19, %v1589_v12  ;;  %v3123_v27 = vpop.eup %3122  ;;  %v2338_v57 = vsel %vm142_vm0, %v2237_v20, 0.0  ;;  %v2269_v24 = vsel %vm142_vm0, %v2205_v16, 0.0  ;;  %v2075_v25 = vmul.f32 %v3926_v5, %v2043_v54  ;;  %v3282_v5 = vld [vmem:[%s5120_s0] sm:$0xff] }
 0x1c0   :  { %v2107_v1 = vmul.f32 %v3930_v52, %v2043_v54  ;;  %v2014_v59 = vsub.f32 2.0, %v1982_v31  ;;  %v1981_v61 = vmul.f32 %v3123_v27, %v3966_v58  ;;  %v1873_v29 = vsel %vm142_vm0, %v4029_v23, 0.0  ;;  %v3283_v58 = vld [vmem:[%s5120_s0 + $0x100] sm:$0xff]  ;;  %v1401_v34 = vpop.permute.xlu0 %1400 }
 0x1c1   :  { %3134 = vpow2.f32 %v1805_v47  ;;  %v4043_v35 = vpop.eup %3124  ;;  %2139 = vst.msk [vmem:[%s5125_s5] sm:$0xff] %vm142_vm0, %v2075_v25  ;;  %v2204_v52 = vmul.f32 %v3282_v5, %v2075_v25  ;;  %v4059_v63 = vadd.f32 %v1873_v29, %v1872_v17  ;;  %v1739_v7 = vmul.f32 1.442695, %v1667_v32  ;;  %v4100_v17 = vpop.permute.xlu1 %1240 }
 0x1c2   :  { %2171 = vst.msk [vmem:[%s5125_s5 + $0x100] sm:$0xff] %vm142_vm0, %v2107_v1  ;;  %v2236_v62 = vmul.f32 %v3283_v58, %v2107_v1  ;;  %v4061_v10 = vpop.eup %3126  ;;  %v2046_v18 = vmul.f32 %v3117_v50, %v2014_v59  ;;  %v2013_v15 = vsub.f32 2.0, %v1981_v61  ;;  %v1869_v19 = vsel %vm142_vm0, %v4043_v35, 0.0 }
 0x1c3   :  { %v1803_v22 = vmul.f32 1.442695, %v1699_v55  ;;  %v2268_v26 = vsel %vm142_vm0, %v2204_v52, 0.0  ;;  %3136 = vrcp.f32 %v4059_v63  ;;  %v1870_v36 = vsel %vm142_vm0, %v4061_v10, 0.0 }
 0x1c4   :  { %v2337_v28 = vsel %vm142_vm0, %v2236_v62, 0.0  ;;  %v3129_v49 = vpop.eup %3128  ;;  %v2270_v41 = vadd.f32 %v2269_v24, %v2268_v26  ;;  %v2078_v56 = vmul.f32 %v3940_v48, %v2046_v18  ;;  %v2110_v30 = vmul.f32 %v3944_v46, %v2046_v18  ;;  %v3284_v48 = vld [vmem:[%s5120_s0 + $0x18] sm:$0xff] }
 0x1c5   :  { %v2339_v53 = vadd.f32 %v2338_v57, %v2337_v28  ;;  %v2045_v3 = vmul.f32 %v3123_v27, %v2013_v15  ;;  %v1984_v38 = vmul.f32 %v3129_v49, %v3987_v37  ;;  %v4073_v47 = vadd.f32 %v1870_v36, %v1869_v19  ;;  %v3285_v37 = vld [vmem:[%s5120_s0 + $0x118] sm:$0xff] }
 0x1c6   :  { %3138 = vpow2.f32 %v1739_v7  ;;  %v4075_v40 = vpop.eup %3130  ;;  %2142 = vst.msk [vmem:[%s5125_s5 + $0x18] sm:$0xff] %vm142_vm0, %v2078_v56  ;;  %2174 = vst.msk [vmem:[%s5125_s5 + $0x118] sm:$0xff] %vm142_vm0, %v2110_v30  ;;  %v2207_v46 = vmul.f32 %v3284_v48, %v2078_v56  ;;  %v2239_v45 = vmul.f32 %v3285_v37, %v2110_v30  ;;  %v1510_v4 = vmul.f32 %v3892_v21, %v1231_v60  ;;  %v3287_v60 = vld [vmem:[%s5120_s0 + $0x110] sm:$0xff] }
 0x1c7   :  { %3140 = vpow2.f32 %v1803_v22  ;;  %v2077_v14 = vmul.f32 %v3951_v51, %v2045_v3  ;;  %v2109_v50 = vmul.f32 %v3957_v2, %v2045_v3  ;;  %v2016_v12 = vsub.f32 2.0, %v1984_v38  ;;  %v3286_v51 = vld [vmem:[%s5120_s0 + $0x10] sm:$0xff]  ;;  %v4151_v22 = vpop.permute.xlu0 %1235 }
 0x1c8   :  { %3142 = vrcp.f32 %v4073_v47  ;;  %v3133_v16 = vpop.eup %3132  ;;  %v2273_v39 = vsel %vm142_vm0, %v2207_v46, 0.0  ;;  %v2342_v20 = vsel %vm142_vm0, %v2239_v45, 0.0  ;;  %v1878_v54 = vsel %vm142_vm0, %v4075_v40, 0.0 }
 0x1c9   :  { %v1596_v31 = vsel %vm142_vm0, %v1510_v4, -inf  ;;  %2141 = vst.msk [vmem:[%s5125_s5 + $0x10] sm:$0xff] %vm142_vm0, %v2077_v14  ;;  %2173 = vst.msk [vmem:[%s5125_s5 + $0x110] sm:$0xff] %vm142_vm0, %v2109_v50  ;;  %v2206_v2 = vmul.f32 %v3286_v51, %v2077_v14  ;;  %v2238_v32 = vmul.f32 %v3287_v60, %v2109_v50  ;;  %v2048_v55 = vmul.f32 %v3129_v49, %v2016_v12  ;;  %v4154_v49 = vpop.permute.xlu1 %1395 }
 0x1ca   :  { %v1983_v27 = vmul.f32 %v3133_v16, %v4006_v33  ;;  %v1598_v24 = vmax.f32 %v1596_v31, %v4010_v6  ;;  %v4121_v25 = vmul.f32 %v3892_v21, %v1226_v8  ;;  %v4124_v1 = vmul.f32 %v3892_v21, %v1386_v9  ;;  %v3289_v8 = vld [vmem:[%s5120_s0 + $0x128] sm:$0xff] }
 0x1cb   :  { %v4117_v57 = vpop.eup %3134  ;;  %v4127_v59 = vmul.f32 %v3892_v21, %v1401_v34  ;;  %v2271_v61 = vsel %vm142_vm0, %v2206_v2, 0.0  ;;  %v2340_v29 = vsel %vm142_vm0, %v2238_v32, 0.0  ;;  %v2080_v5 = vmul.f32 %v3973_v0, %v2048_v55  ;;  %v3288_v0 = vld [vmem:[%s5120_s0 + $0x28] sm:$0xff]  ;;  %v1411_v31 = vpop.permute.xlu0 %1410 }
 0x1cc   :  { %v2112_v33 = vmul.f32 %v3976_v13, %v2048_v55  ;;  %v2272_v52 = vadd.f32 %v2271_v61, %v2270_v41  ;;  %v2341_v58 = vadd.f32 %v2340_v29, %v2339_v53  ;;  %v2015_v6 = vsub.f32 2.0, %v1983_v27  ;;  %v3293_v61 = vld [vmem:[%s5120_s0 + $0x138] sm:$0xff] }
 0x1cd   :  { %v1879_v62 = vsel %vm142_vm0, %v4117_v57, 0.0  ;;  %v3137_v7 = vpop.eup %3136  ;;  %2144 = vst.msk [vmem:[%s5125_s5 + $0x28] sm:$0xff] %vm142_vm0, %v2080_v5  ;;  %v2209_v13 = vmul.f32 %v3288_v0, %v2080_v5  ;;  %v1670_v19 = vsub.f32 %v1510_v4, %v1598_v24  ;;  %v1702_v53 = vsub.f32 %v3995_v11, %v1598_v24  ;;  %v4197_v55 = vpop.permute.xlu1 %1250 }
 0x1ce   :  { %2176 = vst.msk [vmem:[%s5125_s5 + $0x128] sm:$0xff] %vm142_vm0, %v2112_v33  ;;  %v2241_v18 = vmul.f32 %v3289_v8, %v2112_v33  ;;  %v4149_v15 = vadd.f32 %v1879_v62, %v1878_v54  ;;  %v2274_v9 = vadd.f32 %v2273_v39, %v2272_v52  ;;  %v2343_v26 = vadd.f32 %v2342_v20, %v2341_v58 }
 0x1cf   :  { %v2047_v28 = vmul.f32 %v3133_v16, %v2015_v6  ;;  %v1986_v36 = vmul.f32 %v3137_v7, %v4059_v63  ;;  %v2277_v56 = vsel %vm142_vm0, %v2209_v13, 0.0  ;;  %v1745_v4 = vmul.f32 1.442695, %v1670_v19 }
 0x1d0   :  { %v4156_v41 = vpop.eup %3138  ;;  %v2346_v30 = vsel %vm142_vm0, %v2241_v18, 0.0  ;;  %3144 = vrcp.f32 %v4149_v15  ;;  %v1809_v14 = vmul.f32 1.442695, %v1702_v53  ;;  %v1593_v50 = vsel %vm142_vm0, %v4121_v25, -inf }
 0x1d1   :  { %v4162_v3 = vpop.eup %3140  ;;  %v2079_v38 = vmul.f32 %v3989_v43, %v2047_v28  ;;  %v2111_v48 = vmul.f32 %v3997_v44, %v2047_v28  ;;  %v2018_v46 = vsub.f32 2.0, %v1986_v36  ;;  %v1875_v63 = vsel %vm142_vm0, %v4156_v41, 0.0  ;;  %v3290_v43 = vld [vmem:[%s5120_s0 + $0x20] sm:$0xff]  ;;  %v1246_v28 = vpop.permute.xlu0 %1245 }
 0x1d2   :  { %v3143_v37 = vpop.eup %3142  ;;  %v1876_v45 = vsel %vm142_vm0, %v4162_v3, 0.0  ;;  %v3291_v44 = vld [vmem:[%s5120_s0 + $0x120] sm:$0xff]  ;;  %3146 = vpow2.f32 %v1745_v4  ;;  %v1594_v20 = vsel %vm142_vm0, %v4124_v1, -inf  ;;  %v1603_v54 = vsel %vm142_vm0, %v4127_v59, -inf  ;;  %v1406_v53 = vpop.permute.xlu1 %1405 }
 0x1d3   :  { %2143 = vst.msk [vmem:[%s5125_s5 + $0x20] sm:$0xff] %vm142_vm0, %v2079_v38  ;;  %2175 = vst.msk [vmem:[%s5125_s5 + $0x120] sm:$0xff] %vm142_vm0, %v2111_v48  ;;  %v2208_v11 = vmul.f32 %v3290_v43, %v2079_v38  ;;  %v2240_v12 = vmul.f32 %v3291_v44, %v2111_v48  ;;  %v2050_v34 = vmul.f32 %v3137_v7, %v2018_v46 }
 0x1d4   :  { %v1985_v16 = vmul.f32 %v3143_v37, %v4073_v47  ;;  %v4187_v39 = vadd.f32 %v1876_v45, %v1875_v63  ;;  %v1595_v5 = vmax.f32 %v1593_v50, %v1594_v20  ;;  %v1512_v6 = vmul.f32 %v3892_v21, %v4100_v17 }
 0x1d5   :  { %v2275_v51 = vsel %vm142_vm0, %v2208_v11, 0.0  ;;  %v2344_v2 = vsel %vm142_vm0, %v2240_v12, 0.0  ;;  %v2082_v60 = vmul.f32 %v4012_v42, %v2050_v34  ;;  %v2114_v32 = vmul.f32 %v4029_v23, %v2050_v34  ;;  %v3292_v42 = vld [vmem:[%s5120_s0 + $0x38] sm:$0xff] }
 0x1d6   :  { %v2276_v47 = vadd.f32 %v2275_v51, %v2274_v9  ;;  %v2345_v27 = vadd.f32 %v2344_v2, %v2343_v26  ;;  %v2017_v24 = vsub.f32 2.0, %v1985_v16  ;;  %3148 = vrcp.f32 %v4187_v39  ;;  %v1261_v16 = vpop.permute.xlu0 %1260 }
 0x1d7   :  { %2146 = vst.msk [vmem:[%s5125_s5 + $0x38] sm:$0xff] %vm142_vm0, %v2082_v60  ;;  %2178 = vst.msk [vmem:[%s5125_s5 + $0x138] sm:$0xff] %vm142_vm0, %v2114_v32  ;;  %v2211_v23 = vmul.f32 %v3292_v42, %v2082_v60  ;;  %v2243_v29 = vmul.f32 %v3293_v61, %v2114_v32  ;;  %3150 = vpow2.f32 %v1809_v14  ;;  %v1669_v0 = vsub.f32 %v4121_v25, %v1595_v5  ;;  %v3295_v25 = vld [vmem:[%s5120_s0 + $0x130] sm:$0xff]  ;;  %v1421_v32 = vpop.permute.xlu1 %1420 }
 0x1d8   :  { %v2278_v33 = vadd.f32 %v2277_v56, %v2276_v47  ;;  %v2347_v52 = vadd.f32 %v2346_v30, %v2345_v27  ;;  %v2049_v58 = vmul.f32 %v3143_v37, %v2017_v24  ;;  %v1701_v13 = vsub.f32 %v4124_v1, %v1595_v5 }
 0x1d9   :  { %v2281_v62 = vsel %vm142_vm0, %v2211_v23, 0.0  ;;  %v2350_v7 = vsel %vm142_vm0, %v2243_v29, 0.0  ;;  %v1602_v9 = vsel %vm142_vm0, %v1512_v6, -inf  ;;  %v1511_v26 = vmul.f32 %v3892_v21, %v4151_v22 }
 0x1da   :  { %v3145_v8 = vpop.eup %3144  ;;  %v2081_v18 = vmul.f32 %v4043_v35, %v2049_v58  ;;  %v2113_v19 = vmul.f32 %v4061_v10, %v2049_v58  ;;  %v1743_v36 = vmul.f32 1.442695, %v1669_v0  ;;  %v1807_v56 = vmul.f32 1.442695, %v1701_v13  ;;  %v3294_v35 = vld [vmem:[%s5120_s0 + $0x30] sm:$0xff]  ;;  %v1256_v0 = vpop.permute.xlu0 %1255 }
 0x1db   :  { %v1988_v17 = vmul.f32 %v3145_v8, %v4149_v15  ;;  %v1604_v30 = vmax.f32 %v1602_v9, %v1603_v54  ;;  %v1599_v15 = vsel %vm142_vm0, %v1511_v26, -inf  ;;  %v1543_v22 = vmul.f32 %v3892_v21, %v4154_v49 }
 0x1dc   :  { %2145 = vst.msk [vmem:[%s5125_s5 + $0x30] sm:$0xff] %vm142_vm0, %v2081_v18  ;;  %2177 = vst.msk [vmem:[%s5125_s5 + $0x130] sm:$0xff] %vm142_vm0, %v2113_v19  ;;  %v2210_v10 = vmul.f32 %v3294_v35, %v2081_v18  ;;  %v2242_v1 = vmul.f32 %v3295_v25, %v2113_v19  ;;  %3152 = vpow2.f32 %v1743_v36  ;;  %v4244_v63 = vpop.eup %3146  ;;  %v1514_v58 = vmul.f32 %v3892_v21, %v4197_v55 }
 0x1dd   :  { %v2020_v38 = vsub.f32 2.0, %v1988_v17  ;;  %v1672_v48 = vsub.f32 %v1512_v6, %v1604_v30  ;;  %v1704_v46 = vsub.f32 %v4127_v59, %v1604_v30  ;;  %3154 = vpow2.f32 %v1807_v56 }
 0x1de   :  { %v2279_v37 = vsel %vm142_vm0, %v2210_v10, 0.0  ;;  %v2348_v45 = vsel %vm142_vm0, %v2242_v1, 0.0  ;;  %v1600_v4 = vsel %vm142_vm0, %v1543_v22, -inf  ;;  %v1884_v49 = vsel %vm142_vm0, %v4244_v63, 0.0  ;;  %v3299_v10 = vld [vmem:[%s5120_s0 + $0x140] sm:$0xff] }
 0x1df   :  { %v2280_v14 = vadd.f32 %v2279_v37, %v2278_v33  ;;  %v2349_v50 = vadd.f32 %v2348_v45, %v2347_v52  ;;  %v2052_v43 = vmul.f32 %v3145_v8, %v2020_v38  ;;  %v1749_v44 = vmul.f32 1.442695, %v1672_v48 }
 0x1e0   :  { %v3149_v11 = vpop.eup %3148  ;;  %v1813_v12 = vmul.f32 1.442695, %v1704_v46  ;;  %v1601_v34 = vmax.f32 %v1599_v15, %v1600_v4  ;;  %v4252_v59 = vmul.f32 %v3892_v21, %v1411_v31  ;;  %v1608_v8 = vsel %vm142_vm0, %v1514_v58, -inf }
 0x1e1   :  { %v4254_v20 = vpop.eup %3150  ;;  %v2084_v54 = vmul.f32 %v4075_v40, %v2052_v43  ;;  %v2116_v51 = vmul.f32 %v4117_v57, %v2052_v43  ;;  %v2282_v2 = vadd.f32 %v2281_v62, %v2280_v14  ;;  %v2351_v60 = vadd.f32 %v2350_v7, %v2349_v50  ;;  %v3296_v40 = vld [vmem:[%s5120_s0 + $0x48] sm:$0xff]  ;;  %v1271_v50 = vpop.permute.xlu0 %1270 }
 0x1e2   :  { %v1987_v47 = vmul.f32 %v3149_v11, %v4187_v39  ;;  %v1885_v27 = vsel %vm142_vm0, %v4254_v20, 0.0  ;;  %3156 = vpow2.f32 %v1749_v44  ;;  %v1671_v24 = vsub.f32 %v1511_v26, %v1601_v34  ;;  %v3297_v39 = vld [vmem:[%s5120_s0 + $0x148] sm:$0xff]  ;;  %v1416_v26 = vpop.permute.xlu1 %1415 }
 0x1e3   :  { %2148 = vst.msk [vmem:[%s5125_s5 + $0x48] sm:$0xff] %vm142_vm0, %v2084_v54  ;;  %2180 = vst.msk [vmem:[%s5125_s5 + $0x148] sm:$0xff] %vm142_vm0, %v2116_v51  ;;  %v2213_v57 = vmul.f32 %v3296_v40, %v2084_v54  ;;  %v2245_v31 = vmul.f32 %v3297_v39, %v2116_v51  ;;  %v4275_v42 = vadd.f32 %v1885_v27, %v1884_v49  ;;  %3158 = vpow2.f32 %v1813_v12 }
 0x1e4   :  { %v2019_v23 = vsub.f32 2.0, %v1987_v47  ;;  %v1703_v61 = vsub.f32 %v1543_v22, %v1601_v34  ;;  %v1747_v29 = vmul.f32 1.442695, %v1671_v24  ;;  %v1609_v5 = vsel %vm142_vm0, %v4252_v59, -inf }
 0x1e5   :  { %v2285_v33 = vsel %vm142_vm0, %v2213_v57, 0.0  ;;  %v2354_v52 = vsel %vm142_vm0, %v2245_v31, 0.0  ;;  %3160 = vrcp.f32 %v4275_v42  ;;  %v1513_v7 = vmul.f32 %v3892_v21, %v1246_v28 }
 0x1e6   :  { %v2051_v6 = vmul.f32 %v3149_v11, %v2019_v23  ;;  %3162 = vpow2.f32 %v1747_v29  ;;  %v1811_v62 = vmul.f32 1.442695, %v1703_v61  ;;  %v4285_v13 = vpop.eup %3152  ;;  %v1545_v18 = vmul.f32 %v3892_v21, %v1406_v53  ;;  %v1431_v34 = vpop.permute.xlu1 %1430 }
 0x1e7   :  { %v4290_v19 = vmul.f32 %v3892_v21, %v1261_v16  ;;  %v4293_v9 = vmul.f32 %v3892_v21, %v1421_v32  ;;  %v4295_v55 = vpop.eup %3154  ;;  %v1881_v36 = vsel %vm142_vm0, %v4285_v13, 0.0  ;;  %v1610_v30 = vmax.f32 %v1608_v8, %v1609_v5 }
 0x1e8   :  { %v2083_v17 = vmul.f32 %v4156_v41, %v2051_v6  ;;  %v2115_v28 = vmul.f32 %v4162_v3, %v2051_v6  ;;  %3164 = vpow2.f32 %v1811_v62  ;;  %v1882_v56 = vsel %vm142_vm0, %v4295_v55, 0.0  ;;  %v3298_v41 = vld [vmem:[%s5120_s0 + $0x40] sm:$0xff] }
 0x1e9   :  { %v1605_v53 = vsel %vm142_vm0, %v1513_v7, -inf  ;;  %v1606_v35 = vsel %vm142_vm0, %v1545_v18, -inf  ;;  %v1883_v1 = vadd.f32 %v1882_v56, %v1881_v36  ;;  %v1674_v22 = vsub.f32 %v1514_v58, %v1610_v30 }
 0x1ea   :  { %2147 = vst.msk [vmem:[%s5125_s5 + $0x40] sm:$0xff] %vm142_vm0, %v2083_v17  ;;  %2179 = vst.msk [vmem:[%s5125_s5 + $0x140] sm:$0xff] %vm142_vm0, %v2115_v28  ;;  %v2212_v3 = vmul.f32 %v3298_v41, %v2083_v17  ;;  %v2244_v25 = vmul.f32 %v3299_v10, %v2115_v28  ;;  %v1607_v15 = vmax.f32 %v1605_v53, %v1606_v35  ;;  %v1614_v48 = vsel %vm142_vm0, %v4290_v19, -inf  ;;  %v1426_v62 = vpop.permute.xlu1 %1425 }
 0x1eb   :  { %v1706_v38 = vsub.f32 %v4252_v59, %v1610_v30  ;;  %v1615_v46 = vsel %vm142_vm0, %v4293_v9, -inf  ;;  %3166 = vrcp.f32 %v1883_v1  ;;  %v1753_v12 = vmul.f32 1.442695, %v1674_v22 }
 0x1ec   :  { %v4324_v37 = vpop.eup %3156  ;;  %v2283_v45 = vsel %vm142_vm0, %v2212_v3, 0.0  ;;  %v2352_v4 = vsel %vm142_vm0, %v2244_v25, 0.0  ;;  %v1673_v14 = vsub.f32 %v1513_v7, %v1607_v15  ;;  %v1705_v54 = vsub.f32 %v1545_v18, %v1607_v15 }
 0x1ed   :  { %v4328_v43 = vpop.eup %3158  ;;  %v2284_v49 = vadd.f32 %v2283_v45, %v2282_v2  ;;  %v2353_v11 = vadd.f32 %v2352_v4, %v2351_v60  ;;  %v1890_v44 = vsel %vm142_vm0, %v4324_v37, 0.0  ;;  %v1817_v16 = vmul.f32 1.442695, %v1706_v38 }
 0x1ee   :  { %v1891_v59 = vsel %vm142_vm0, %v4328_v43, 0.0  ;;  %v1751_v51 = vmul.f32 1.442695, %v1673_v14  ;;  %3168 = vpow2.f32 %v1753_v12  ;;  %v1815_v40 = vmul.f32 1.442695, %v1705_v54 }
 0x1ef   :  { %v3161_v32 = vpop.eup %3160  ;;  %v4334_v47 = vadd.f32 %v2285_v33, %v2284_v49  ;;  %v4336_v27 = vadd.f32 %v2354_v52, %v2353_v11  ;;  %v4338_v24 = vadd.f32 %v1891_v59, %v1890_v44  ;;  %3170 = vpow2.f32 %v1817_v16  ;;  %v1266_v33 = vpop.permute.xlu0 %1265 }
 0x1f0   :  { %v4340_v2 = vpop.eup %3162  ;;  %v1990_v60 = vmul.f32 %v3161_v32, %v4275_v42  ;;  %v1616_v57 = vmax.f32 %v1614_v48, %v1615_v46  ;;  %v1515_v31 = vmul.f32 %v3892_v21, %v1256_v0  ;;  %v1547_v23 = vmul.f32 %v3892_v21, %v1416_v26 }
 0x1f1   :  { %3172 = vrcp.f32 %v4338_v24  ;;  %v1887_v39 = vsel %vm142_vm0, %v4340_v2, 0.0  ;;  %v4361_v17 = vmul.f32 %v3892_v21, %v1266_v33  ;;  %v4367_v30 = vmul.f32 %v3892_v21, %v1426_v62 }
 0x1f2   :  { %v4348_v61 = vpop.eup %3164  ;;  %v2022_v29 = vsub.f32 2.0, %v1990_v60  ;;  %3174 = vpow2.f32 %v1751_v51  ;;  %v1676_v5 = vsub.f32 %v4290_v19, %v1616_v57  ;;  %v1708_v42 = vsub.f32 %v4293_v9, %v1616_v57 }
 0x1f3   :  { %v1888_v52 = vsel %vm142_vm0, %v4348_v61, 0.0  ;;  %3176 = vpow2.f32 %v1815_v40  ;;  %v1611_v58 = vsel %vm142_vm0, %v1515_v31, -inf  ;;  %v1612_v6 = vsel %vm142_vm0, %v1547_v23, -inf  ;;  %v1281_v57 = vpop.permute.xlu0 %1280 }
 0x1f4   :  { %v2054_v7 = vmul.f32 %v3161_v32, %v2022_v29  ;;  %v4356_v0 = vadd.f32 %v1888_v52, %v1887_v39  ;;  %v1757_v8 = vmul.f32 1.442695, %v1676_v5  ;;  %v1821_v18 = vmul.f32 1.442695, %v1708_v42 }
 0x1f5   :  { %v1613_v26 = vmax.f32 %v1611_v58, %v1612_v6  ;;  %v1518_v19 = vmul.f32 %v3892_v21, %v1271_v50  ;;  %v1550_v9 = vmul.f32 %v3892_v21, %v1431_v34  ;;  %v3167_v28 = vpop.eup %3166  ;;  %v1617_v44 = vsel %vm142_vm0, %v4361_v17, -inf  ;;  %v4432_v6 = vld [vmem:[%s5123_s3] ss:$0 sm:$0xff] }
 0x1f6   :  { %v2086_v36 = vmul.f32 %v4244_v63, %v2054_v7  ;;  %v2118_v56 = vmul.f32 %v4254_v20, %v2054_v7  ;;  %3178 = vrcp.f32 %v4356_v0  ;;  %v1989_v53 = vmul.f32 %v3167_v28, %v1883_v1  ;;  %v3300_v63 = vld [vmem:[%s5120_s0 + $0x58] sm:$0xff] }
 0x1f7   :  { %3180 = vpow2.f32 %v1757_v8  ;;  %v1675_v35 = vsub.f32 %v1515_v31, %v1613_v26  ;;  %v1707_v41 = vsub.f32 %v1547_v23, %v1613_v26  ;;  %v3301_v20 = vld [vmem:[%s5120_s0 + $0x158] sm:$0xff]  ;;  %v1620_v10 = vsel %vm142_vm0, %v1518_v19, -inf  ;;  %v3303_v23 = vld [vmem:[%s5120_s0 + $0x150] sm:$0xff] }
 0x1f8   :  { %2150 = vst.msk [vmem:[%s5125_s5 + $0x58] sm:$0xff] %vm142_vm0, %v2086_v36  ;;  %2182 = vst.msk [vmem:[%s5125_s5 + $0x158] sm:$0xff] %vm142_vm0, %v2118_v56  ;;  %v2215_v21 = vmul.f32 %v3300_v63, %v2086_v36  ;;  %v2247_v3 = vmul.f32 %v3301_v20, %v2118_v56  ;;  %3182 = vpow2.f32 %v1821_v18  ;;  %v4384_v25 = vpop.eup %3168  ;;  %v2021_v1 = vsub.f32 2.0, %v1989_v53  ;;  %v1441_v53 = vpop.permute.xlu1 %1440 }
 0x1f9   :  { %v1755_v15 = vmul.f32 1.442695, %v1675_v35  ;;  %v1819_v22 = vmul.f32 1.442695, %v1707_v41  ;;  %v1621_v38 = vsel %vm142_vm0, %v1550_v9, -inf  ;;  %v4387_v48 = vpop.eup %3170  ;;  %v1896_v4 = vsel %vm142_vm0, %v4384_v25, 0.0 }
 0x1fa   :  { %v2289_v46 = vsel %vm142_vm0, %v2215_v21, 0.0  ;;  %v2358_v45 = vsel %vm142_vm0, %v2247_v3, 0.0  ;;  %v1622_v14 = vmax.f32 %v1620_v10, %v1621_v38  ;;  %v2053_v49 = vmul.f32 %v3167_v28, %v2021_v1 }
 0x1fb   :  { %v3173_v50 = vpop.eup %3172  ;;  %v1897_v11 = vsel %vm142_vm0, %v4387_v48, 0.0  ;;  %3184 = vpow2.f32 %v1755_v15  ;;  %v1618_v58 = vsel %vm142_vm0, %v4367_v30, -inf  ;;  %v4435_v62 = vmul.f32 %v4432_v6, %v1281_v57 }
 0x1fc   :  { %v4397_v12 = vpop.eup %3174  ;;  %v1992_v34 = vmul.f32 %v3173_v50, %v4338_v24  ;;  %v4400_v59 = vadd.f32 %v1897_v11, %v1896_v4  ;;  %3186 = vpow2.f32 %v1819_v22  ;;  %v1678_v16 = vsub.f32 %v1518_v19, %v1622_v14 }
 0x1fd   :  { %v4402_v54 = vpop.eup %3176  ;;  %v2085_v51 = vmul.f32 %v4285_v13, %v2053_v49  ;;  %v2117_v32 = vmul.f32 %v4295_v55, %v2053_v49  ;;  %v1893_v60 = vsel %vm142_vm0, %v4397_v12, 0.0  ;;  %v1710_v40 = vsub.f32 %v1550_v9, %v1622_v14  ;;  %v3302_v13 = vld [vmem:[%s5120_s0 + $0x50] sm:$0xff] }
 0x1fe   :  { %v2024_v39 = vsub.f32 2.0, %v1992_v34  ;;  %3188 = vrcp.f32 %v4400_v59  ;;  %v1894_v24 = vsel %vm142_vm0, %v4402_v54, 0.0  ;;  %v1761_v31 = vmul.f32 1.442695, %v1678_v16 }
 0x1ff   :  { %2149 = vst.msk [vmem:[%s5125_s5 + $0x50] sm:$0xff] %vm142_vm0, %v2085_v51  ;;  %2181 = vst.msk [vmem:[%s5125_s5 + $0x150] sm:$0xff] %vm142_vm0, %v2117_v32  ;;  %v2214_v55 = vmul.f32 %v3302_v13, %v2085_v51  ;;  %v2246_v29 = vmul.f32 %v3303_v23, %v2117_v32  ;;  %v4425_v5 = vadd.f32 %v1894_v24, %v1893_v60  ;;  %v1825_v42 = vmul.f32 1.442695, %v1710_v40  ;;  %v1436_v60 = vpop.permute.xlu1 %1435 }
 0x200   :  { %v3179_v33 = vpop.eup %3178  ;;  %v2056_v52 = vmul.f32 %v3173_v50, %v2024_v39  ;;  %3190 = vpow2.f32 %v1761_v31  ;;  %v1619_v1 = vmax.f32 %v1617_v44, %v1618_v58  ;;  %v1626_v15 = vsel %vm142_vm0, %v4435_v62, -inf }
 0x201   :  { %v4437_v7 = vpop.eup %3180  ;;  %v2287_v8 = vsel %vm142_vm0, %v2214_v55, 0.0  ;;  %v2356_v18 = vsel %vm142_vm0, %v2246_v29, 0.0  ;;  %v1991_v26 = vmul.f32 %v3179_v33, %v4356_v0  ;;  %3192 = vrcp.f32 %v4425_v5 }
 0x202   :  { %v4443_v19 = vpop.eup %3182  ;;  %v2288_v9 = vadd.f32 %v2287_v8, %v4334_v47  ;;  %v2357_v28 = vadd.f32 %v2356_v18, %v4336_v27  ;;  %v2088_v36 = vmul.f32 %v4324_v37, %v2056_v52  ;;  %v2120_v56 = vmul.f32 %v4328_v43, %v2056_v52  ;;  %v3305_v37 = vld [vmem:[%s5120_s0 + $0x68] sm:$0xff] }
 0x203   :  { %v2023_v35 = vsub.f32 2.0, %v1991_v26  ;;  %v1902_v41 = vsel %vm142_vm0, %v4437_v7, 0.0  ;;  %v1903_v0 = vsel %vm142_vm0, %v4443_v19, 0.0  ;;  %3194 = vpow2.f32 %v1825_v42  ;;  %v3306_v47 = vld [vmem:[%s5120_s0 + $0x168] sm:$0xff] }
 0x204   :  { %2152 = vst.msk [vmem:[%s5125_s5 + $0x68] sm:$0xff] %vm142_vm0, %v2088_v36  ;;  %2184 = vst.msk [vmem:[%s5125_s5 + $0x168] sm:$0xff] %vm142_vm0, %v2120_v56  ;;  %v2217_v43 = vmul.f32 %v3305_v37, %v2088_v36  ;;  %v2249_v27 = vmul.f32 %v3306_v47, %v2120_v56  ;;  %v2290_v63 = vadd.f32 %v2289_v46, %v2288_v9 }
 0x205   :  { %v2359_v21 = vadd.f32 %v2358_v45, %v2357_v28  ;;  %v4467_v20 = vpop.eup %3184  ;;  %v2055_v3 = vmul.f32 %v3179_v33, %v2023_v35  ;;  %v4469_v10 = vadd.f32 %v1903_v0, %v1902_v41  ;;  %v1552_v46 = vmul.f32 %v4432_v6, %v1441_v53  ;;  %v1276_v45 = vpop.permute.xlu0 %1275 }
 0x206   :  { %v4473_v22 = vpop.eup %3186  ;;  %v2293_v38 = vsel %vm142_vm0, %v2217_v43, 0.0  ;;  %v2362_v4 = vsel %vm142_vm0, %v2249_v27, 0.0  ;;  %v1899_v14 = vsel %vm142_vm0, %v4467_v20, 0.0  ;;  %v1677_v16 = vsub.f32 %v4361_v17, %v1619_v1  ;;  %v3308_v17 = vld [vmem:[%s5120_s0 + $0x160] sm:$0xff]  ;;  %v1451_v41 = vpop.permute.xlu1 %1450 }
 0x207   :  { %v2087_v50 = vmul.f32 %v4340_v2, %v2055_v3  ;;  %v2119_v49 = vmul.f32 %v4348_v61, %v2055_v3  ;;  %3196 = vrcp.f32 %v4469_v10  ;;  %v1900_v11 = vsel %vm142_vm0, %v4473_v22, 0.0  ;;  %v3307_v2 = vld [vmem:[%s5120_s0 + $0x60] sm:$0xff]  ;;  %v3310_v3 = vld [vmem:[%s5120_s0 + $0x178] sm:$0xff] }
 0x208   :  { %v3189_v44 = vpop.eup %3188  ;;  %v4485_v34 = vadd.f32 %v1900_v11, %v1899_v14  ;;  %v1709_v51 = vsub.f32 %v4367_v30, %v1619_v1  ;;  %v1627_v32 = vsel %vm142_vm0, %v1552_v46, -inf  ;;  %v1759_v24 = vmul.f32 1.442695, %v1677_v16 }
 0x209   :  { %2151 = vst.msk [vmem:[%s5125_s5 + $0x60] sm:$0xff] %vm142_vm0, %v2087_v50  ;;  %2183 = vst.msk [vmem:[%s5125_s5 + $0x160] sm:$0xff] %vm142_vm0, %v2119_v49  ;;  %v2216_v61 = vmul.f32 %v3307_v2, %v2087_v50  ;;  %v2248_v30 = vmul.f32 %v3308_v17, %v2119_v49  ;;  %v1994_v40 = vmul.f32 %v3189_v44, %v4400_v59  ;;  %v1291_v8 = vpop.permute.xlu0 %1290 }
 0x20a   :  { %v1628_v57 = vmax.f32 %v1626_v15, %v1627_v32  ;;  %v4505_v39 = vpop.eup %3190  ;;  %3198 = vrcp.f32 %v4485_v34  ;;  %v1823_v31 = vmul.f32 1.442695, %v1709_v51  ;;  %v4509_v13 = vmul.f32 %v4432_v6, %v1276_v45  ;;  %v1446_v32 = vpop.permute.xlu1 %1445 }
 0x20b   :  { %v3193_v55 = vpop.eup %3192  ;;  %v2291_v23 = vsel %vm142_vm0, %v2216_v61, 0.0  ;;  %v2360_v29 = vsel %vm142_vm0, %v2248_v30, 0.0  ;;  %v2026_v42 = vsub.f32 2.0, %v1994_v40  ;;  %v1908_v33 = vsel %vm142_vm0, %v4505_v39, 0.0 }
 0x20c   :  { %v2292_v59 = vadd.f32 %v2291_v23, %v2290_v63  ;;  %v2361_v52 = vadd.f32 %v2360_v29, %v2359_v21  ;;  %v1993_v58 = vmul.f32 %v3193_v55, %v4425_v5  ;;  %3200 = vpow2.f32 %v1759_v24 }
 0x20d   :  { %v4516_v18 = vpop.eup %3194  ;;  %v2058_v26 = vmul.f32 %v3189_v44, %v2026_v42  ;;  %3202 = vpow2.f32 %v1823_v31  ;;  %v1680_v9 = vsub.f32 %v4435_v62, %v1628_v57  ;;  %v1712_v28 = vsub.f32 %v1552_v46, %v1628_v57  ;;  %v1286_v46 = vpop.permute.xlu0 %1285 }
 0x20e   :  { %v2294_v36 = vadd.f32 %v2293_v38, %v2292_v59  ;;  %v2363_v56 = vadd.f32 %v2362_v4, %v2361_v52  ;;  %v2025_v53 = vsub.f32 2.0, %v1993_v58  ;;  %v1909_v35 = vsel %vm142_vm0, %v4516_v18, 0.0 }
 0x20f   :  { %v2090_v0 = vmul.f32 %v4384_v25, %v2058_v26  ;;  %v2122_v5 = vmul.f32 %v4387_v48, %v2058_v26  ;;  %v4523_v37 = vadd.f32 %v1909_v35, %v1908_v33  ;;  %v1765_v43 = vmul.f32 1.442695, %v1680_v9  ;;  %v3309_v25 = vld [vmem:[%s5120_s0 + $0x78] sm:$0xff] }
 0x210   :  { %v2057_v47 = vmul.f32 %v3193_v55, %v2025_v53  ;;  %v1829_v27 = vmul.f32 1.442695, %v1712_v28  ;;  %v1623_v62 = vsel %vm142_vm0, %v4509_v13, -inf  ;;  %v1551_v63 = vmul.f32 %v4432_v6, %v1436_v60  ;;  %v3314_v28 = vld [vmem:[%s5120_s0 + $0x188] sm:$0xff] }
 0x211   :  { %v3197_v21 = vpop.eup %3196  ;;  %2154 = vst.msk [vmem:[%s5125_s5 + $0x78] sm:$0xff] %vm142_vm0, %v2090_v0  ;;  %2186 = vst.msk [vmem:[%s5125_s5 + $0x178] sm:$0xff] %vm142_vm0, %v2122_v5  ;;  %v2219_v48 = vmul.f32 %v3309_v25, %v2090_v0  ;;  %v2251_v1 = vmul.f32 %v3310_v3, %v2122_v5  ;;  %3204 = vrcp.f32 %v4523_v37  ;;  %v4544_v15 = vmul.f32 %v4432_v6, %v1291_v8  ;;  %v1301_v35 = vpop.permute.xlu0 %1300 }
 0x212   :  { %v2089_v38 = vmul.f32 %v4397_v12, %v2057_v47  ;;  %v2121_v4 = vmul.f32 %v4402_v54, %v2057_v47  ;;  %v1996_v14 = vmul.f32 %v3197_v21, %v4469_v10  ;;  %3206 = vpow2.f32 %v1765_v43  ;;  %v3311_v12 = vld [vmem:[%s5120_s0 + $0x70] sm:$0xff] }
 0x213   :  { %v2297_v45 = vsel %vm142_vm0, %v2219_v48, 0.0  ;;  %v2366_v50 = vsel %vm142_vm0, %v2251_v1, 0.0  ;;  %3208 = vpow2.f32 %v1829_v27  ;;  %v1624_v49 = vsel %vm142_vm0, %v1551_v63, -inf  ;;  %v3312_v10 = vld [vmem:[%s5120_s0 + $0x170] sm:$0xff] }
 0x214   :  { %v3199_v11 = vpop.eup %3198  ;;  %2153 = vst.msk [vmem:[%s5125_s5 + $0x70] sm:$0xff] %vm142_vm0, %v2089_v38  ;;  %2185 = vst.msk [vmem:[%s5125_s5 + $0x170] sm:$0xff] %vm142_vm0, %v2121_v4  ;;  %v2218_v54 = vmul.f32 %v3311_v12, %v2089_v38  ;;  %v2250_v44 = vmul.f32 %v3312_v10, %v2121_v4  ;;  %v2028_v16 = vsub.f32 2.0, %v1996_v14  ;;  %v1625_v51 = vmax.f32 %v1623_v62, %v1624_v49 }
 0x215   :  { %v1995_v60 = vmul.f32 %v3199_v11, %v4485_v34  ;;  %v1632_v2 = vsel %vm142_vm0, %v4544_v15, -inf  ;;  %v4570_v61 = vmul.f32 %v4432_v6, %v1451_v41  ;;  %v4573_v17 = vmul.f32 %v4432_v6, %v1286_v46  ;;  %v1461_v41 = vpop.permute.xlu1 %1460 }
 0x216   :  { %v4575_v30 = vpop.eup %3200  ;;  %v2295_v40 = vsel %vm142_vm0, %v2218_v54, 0.0  ;;  %v2364_v57 = vsel %vm142_vm0, %v2250_v44, 0.0  ;;  %v2060_v24 = vmul.f32 %v3197_v21, %v2028_v16  ;;  %v1679_v31 = vsub.f32 %v4509_v13, %v1625_v51  ;;  %v1296_v44 = vpop.permute.xlu0 %1295 }
 0x217   :  { %v4580_v55 = vpop.eup %3202  ;;  %v2296_v34 = vadd.f32 %v2295_v40, %v2294_v36  ;;  %v2365_v23 = vadd.f32 %v2364_v57, %v2363_v56  ;;  %v2027_v29 = vsub.f32 2.0, %v1995_v60  ;;  %v1905_v42 = vsel %vm142_vm0, %v4575_v30, 0.0 }
 0x218   :  { %v2092_v33 = vmul.f32 %v4437_v7, %v2060_v24  ;;  %v2124_v59 = vmul.f32 %v4443_v19, %v2060_v24  ;;  %v1906_v52 = vsel %vm142_vm0, %v4580_v55, 0.0  ;;  %v1711_v58 = vsub.f32 %v1551_v63, %v1625_v51  ;;  %v3313_v7 = vld [vmem:[%s5120_s0 + $0x88] sm:$0xff] }
 0x219   :  { %v2059_v8 = vmul.f32 %v3199_v11, %v2027_v29  ;;  %v2298_v26 = vadd.f32 %v2297_v45, %v2296_v34  ;;  %v2367_v9 = vadd.f32 %v2366_v50, %v2365_v23  ;;  %v4588_v13 = vadd.f32 %v1906_v52, %v1905_v42  ;;  %v1456_v16 = vpop.permute.xlu1 %1455 }
 0x21a   :  { %2156 = vst.msk [vmem:[%s5125_s5 + $0x88] sm:$0xff] %vm142_vm0, %v2092_v33  ;;  %2188 = vst.msk [vmem:[%s5125_s5 + $0x188] sm:$0xff] %vm142_vm0, %v2124_v59  ;;  %v2221_v19 = vmul.f32 %v3313_v7, %v2092_v33  ;;  %v2253_v36 = vmul.f32 %v3314_v28, %v2124_v59  ;;  %v1763_v56 = vmul.f32 1.442695, %v1679_v31  ;;  %v1827_v53 = vmul.f32 1.442695, %v1711_v58  ;;  %v1311_v28 = vpop.permute.xlu0 %1310 }
 0x21b   :  { %v3205_v0 = vpop.eup %3204  ;;  %v2091_v5 = vmul.f32 %v4467_v20, %v2059_v8  ;;  %v2123_v43 = vmul.f32 %v4473_v22, %v2059_v8  ;;  %3210 = vrcp.f32 %v4588_v13  ;;  %v1633_v47 = vsel %vm142_vm0, %v4570_v61, -inf  ;;  %v3315_v20 = vld [vmem:[%s5120_s0 + $0x80] sm:$0xff] }
 0x21c   :  { %v4609_v27 = vpop.eup %3206  ;;  %v2301_v62 = vsel %vm142_vm0, %v2221_v19, 0.0  ;;  %v2370_v63 = vsel %vm142_vm0, %v2253_v36, 0.0  ;;  %v1998_v21 = vmul.f32 %v3205_v0, %v4523_v37  ;;  %3212 = vpow2.f32 %v1763_v56  ;;  %v3316_v37 = vld [vmem:[%s5120_s0 + $0x180] sm:$0xff] }
 0x21d   :  { %v4614_v25 = vpop.eup %3208  ;;  %2155 = vst.msk [vmem:[%s5125_s5 + $0x80] sm:$0xff] %vm142_vm0, %v2091_v5  ;;  %2187 = vst.msk [vmem:[%s5125_s5 + $0x180] sm:$0xff] %vm142_vm0, %v2123_v43  ;;  %v2220_v22 = vmul.f32 %v3315_v20, %v2091_v5  ;;  %v2252_v48 = vmul.f32 %v3316_v37, %v2123_v43  ;;  %v1914_v3 = vsel %vm142_vm0, %v4609_v27, 0.0  ;;  %3214 = vpow2.f32 %v1827_v53  ;;  %v1471_v36 = vpop.permute.xlu1 %1470 }
 0x21e   :  { %v2030_v1 = vsub.f32 2.0, %v1998_v21  ;;  %v1915_v38 = vsel %vm142_vm0, %v4614_v25, 0.0  ;;  %v1634_v4 = vmax.f32 %v1632_v2, %v1633_v47  ;;  %v1629_v14 = vsel %vm142_vm0, %v4573_v17, -inf }
 0x21f   :  { %v2299_v46 = vsel %vm142_vm0, %v2220_v22, 0.0  ;;  %v2368_v45 = vsel %vm142_vm0, %v2252_v48, 0.0  ;;  %v4638_v50 = vadd.f32 %v1915_v38, %v1914_v3  ;;  %v1553_v49 = vmul.f32 %v4432_v6, %v1446_v32 }
 0x220   :  { %v2300_v11 = vadd.f32 %v2299_v46, %v2298_v26  ;;  %v2369_v12 = vadd.f32 %v2368_v45, %v2367_v9  ;;  %v2062_v54 = vmul.f32 %v3205_v0, %v2030_v1  ;;  %v1682_v10 = vsub.f32 %v4544_v15, %v1634_v4  ;;  %v1306_v45 = vpop.permute.xlu0 %1305 }
 0x221   :  { %3216 = vrcp.f32 %v4638_v50  ;;  %v1714_v51 = vsub.f32 %v4570_v61, %v1634_v4  ;;  %v1630_v60 = vsel %vm142_vm0, %v1553_v49, -inf  ;;  %v1524_v2 = vmul.f32 %v4432_v6, %v1301_v35  ;;  %v3318_v61 = vld [vmem:[%s5120_s0 + $0x198] sm:$0xff] }
 0x222   :  { %v2094_v40 = vmul.f32 %v4505_v39, %v2062_v54  ;;  %v2126_v57 = vmul.f32 %v4516_v18, %v2062_v54  ;;  %v4648_v32 = vadd.f32 %v2301_v62, %v2300_v11  ;;  %v4650_v24 = vadd.f32 %v2370_v63, %v2369_v12  ;;  %v3317_v39 = vld [vmem:[%s5120_s0 + $0x98] sm:$0xff] }
 0x223   :  { %v1769_v31 = vmul.f32 1.442695, %v1682_v10  ;;  %v1833_v15 = vmul.f32 1.442695, %v1714_v51  ;;  %v1631_v34 = vmax.f32 %v1629_v14, %v1630_v60  ;;  %v1638_v23 = vsel %vm142_vm0, %v1524_v2, -inf }
 0x224   :  { %2158 = vst.msk [vmem:[%s5125_s5 + $0x98] sm:$0xff] %vm142_vm0, %v2094_v40  ;;  %2190 = vst.msk [vmem:[%s5125_s5 + $0x198] sm:$0xff] %vm142_vm0, %v2126_v57  ;;  %v2223_v18 = vmul.f32 %v3317_v39, %v2094_v40  ;;  %v2255_v29 = vmul.f32 %v3318_v61, %v2126_v57  ;;  %v1556_v42 = vmul.f32 %v4432_v6, %v1461_v41 }
 0x225   :  { %v1523_v33 = vmul.f32 %v4432_v6, %v1296_v44  ;;  %v3211_v59 = vpop.eup %3210  ;;  %3218 = vpow2.f32 %v1769_v31  ;;  %v1681_v52 = vsub.f32 %v4573_v17, %v1631_v34  ;;  %v1713_v58 = vsub.f32 %v1553_v49, %v1631_v34  ;;  %v1466_v49 = vpop.permute.xlu1 %1465 }
 0x226   :  { %v1555_v8 = vmul.f32 %v4432_v6, %v1456_v16  ;;  %v4671_v26 = vpop.eup %3212  ;;  %v4674_v9 = vsel %vm142_vm0, %v2223_v18, 0.0  ;;  %v4677_v7 = vsel %vm142_vm0, %v2255_v29, 0.0  ;;  %v1997_v19 = vmul.f32 %v3211_v59, %v4588_v13 }
 0x227   :  { %3220 = vpow2.f32 %v1833_v15  ;;  %v4680_v56 = vpop.eup %3214  ;;  %v1911_v17 = vsel %vm142_vm0, %v4671_v26, 0.0  ;;  %v1767_v53 = vmul.f32 1.442695, %v1681_v52  ;;  %v1831_v35 = vmul.f32 1.442695, %v1713_v58 }
 0x228   :  { %v1639_v41 = vsel %vm142_vm0, %v1556_v42, -inf  ;;  %v2029_v0 = vsub.f32 2.0, %v1997_v19  ;;  %v1912_v5 = vsel %vm142_vm0, %v4680_v56, 0.0  ;;  %v1635_v47 = vsel %vm142_vm0, %v1523_v33, -inf }
 0x229   :  { %v1640_v43 = vmax.f32 %v1638_v23, %v1639_v41  ;;  %v4688_v13 = vadd.f32 %v1912_v5, %v1911_v17  ;;  %3222 = vpow2.f32 %v1767_v53  ;;  %v1636_v62 = vsel %vm142_vm0, %v1555_v8, -inf  ;;  %v1481_v52 = vpop.permute.xlu1 %1480 }
 0x22a   :  { %v1526_v63 = vmul.f32 %v4432_v6, %v1311_v28  ;;  %v2061_v21 = vmul.f32 %v3211_v59, %v2029_v0  ;;  %3224 = vpow2.f32 %v1831_v35  ;;  %v1637_v48 = vmax.f32 %v1635_v47, %v1636_v62  ;;  %v1321_v59 = vpop.permute.xlu0 %1320 }
 0x22b   :  { %v1684_v20 = vsub.f32 %v1524_v2, %v1640_v43  ;;  %v1716_v22 = vsub.f32 %v1556_v42, %v1640_v43  ;;  %v3217_v37 = vpop.eup %3216  ;;  %3226 = vrcp.f32 %v4688_v13  ;;  %v1558_v1 = vmul.f32 %v4432_v6, %v1471_v36 }
 0x22c   :  { %v1644_v3 = vsel %vm142_vm0, %v1526_v63, -inf  ;;  %v2093_v38 = vmul.f32 %v4575_v30, %v2061_v21  ;;  %v2125_v4 = vmul.f32 %v4580_v55, %v2061_v21  ;;  %v2000_v14 = vmul.f32 %v3217_v37, %v4638_v50  ;;  %v3319_v30 = vld [vmem:[%s5120_s0 + $0x90] sm:$0xff] }
 0x22d   :  { %v1773_v46 = vmul.f32 1.442695, %v1684_v20  ;;  %v1837_v11 = vmul.f32 1.442695, %v1716_v22  ;;  %v1683_v12 = vsub.f32 %v1523_v33, %v1637_v48  ;;  %v1715_v54 = vsub.f32 %v1555_v8, %v1637_v48  ;;  %v3320_v50 = vld [vmem:[%s5120_s0 + $0x190] sm:$0xff]  ;;  %v1476_v21 = vpop.permute.xlu1 %1475 }
 0x22e   :  { %v1645_v10 = vsel %vm142_vm0, %v1558_v1, -inf  ;;  %2157 = vst.msk [vmem:[%s5125_s5 + $0x90] sm:$0xff] %vm142_vm0, %v2093_v38  ;;  %2189 = vst.msk [vmem:[%s5125_s5 + $0x190] sm:$0xff] %vm142_vm0, %v2125_v4  ;;  %v2222_v55 = vmul.f32 %v3319_v30, %v2093_v38  ;;  %v2254_v44 = vmul.f32 %v3320_v50, %v2125_v4  ;;  %v2032_v16 = vsub.f32 2.0, %v2000_v14 }
 0x22f   :  { %3228 = vpow2.f32 %v1773_v46  ;;  %v4713_v51 = vpop.eup %3218  ;;  %v1771_v60 = vmul.f32 1.442695, %v1683_v12  ;;  %v1835_v2 = vmul.f32 1.442695, %v1715_v54  ;;  %v1646_v40 = vmax.f32 %v1644_v3, %v1645_v10 }
 0x230   :  { %3230 = vpow2.f32 %v1837_v11  ;;  %v2303_v31 = vsel %vm142_vm0, %v2222_v55, 0.0  ;;  %v2372_v15 = vsel %vm142_vm0, %v2254_v44, 0.0  ;;  %v2064_v34 = vmul.f32 %v3217_v37, %v2032_v16 }
 0x231   :  { %v4715_v57 = vpop.eup %3220  ;;  %v1920_v23 = vsel %vm142_vm0, %v4713_v51, 0.0  ;;  %v2304_v39 = vadd.f32 %v2303_v31, %v4648_v32  ;;  %v2373_v18 = vadd.f32 %v2372_v15, %v4650_v24  ;;  %3232 = vpow2.f32 %v1771_v60 }
 0x232   :  { %v1921_v61 = vsel %vm142_vm0, %v4715_v57, 0.0  ;;  %v4726_v29 = vmul.f32 %v4609_v27, %v2064_v34  ;;  %v4729_v42 = vmul.f32 %v4614_v25, %v2064_v34  ;;  %3234 = vpow2.f32 %v1835_v2 }
 0x233   :  { %v1922_v33 = vadd.f32 %v1921_v61, %v1920_v23  ;;  %v4731_v58 = vpop.eup %3222  ;;  %v4734_v32 = vadd.f32 %v4674_v9, %v2304_v39  ;;  %v4737_v24 = vadd.f32 %v4677_v7, %v2373_v18  ;;  %v1686_v8 = vsub.f32 %v1526_v63, %v1646_v40  ;;  %v1316_v63 = vpop.permute.xlu0 %1315 }
 0x234   :  { %v1718_v19 = vsub.f32 %v1558_v1, %v1646_v40  ;;  %v4739_v28 = vpop.eup %3224  ;;  %2160 = vst.msk [vmem:[%s5125_s5 + $0xa8] sm:$0xff] %vm142_vm0, %v4726_v29  ;;  %2192 = vst.msk [vmem:[%s5125_s5 + $0x1a8] sm:$0xff] %vm142_vm0, %v4729_v42  ;;  %v1917_v27 = vsel %vm142_vm0, %v4731_v58, 0.0  ;;  %v1525_v17 = vmul.f32 %v4432_v6, %v1306_v45  ;;  %v1557_v0 = vmul.f32 %v4432_v6, %v1466_v49 }
 0x235   :  { %3236 = vrcp.f32 %v1922_v33  ;;  %v3227_v25 = vpop.eup %3226  ;;  %v1918_v9 = vsel %vm142_vm0, %v4739_v28, 0.0  ;;  %v1777_v7 = vmul.f32 1.442695, %v1686_v8  ;;  %v1528_v5 = vmul.f32 %v4432_v6, %v1321_v59 }
 0x236   :  { %v1841_v36 = vmul.f32 1.442695, %v1718_v19  ;;  %v1999_v53 = vmul.f32 %v3227_v25, %v4688_v13  ;;  %v1919_v35 = vadd.f32 %v1918_v9, %v1917_v27  ;;  %v1641_v41 = vsel %vm142_vm0, %v1525_v17, -inf }
 0x237   :  { %3238 = vpow2.f32 %v1777_v7  ;;  %v1560_v62 = vmul.f32 %v4432_v6, %v1481_v52  ;;  %v1642_v22 = vsel %vm142_vm0, %v1557_v0, -inf  ;;  %v1650_v37 = vsel %vm142_vm0, %v1528_v5, -inf  ;;  %v1326_v27 = vpop.permute.xlu0 %1325 }
 0x238   :  { %v2031_v47 = vsub.f32 2.0, %v1999_v53  ;;  %3240 = vrcp.f32 %v1919_v35  ;;  %v1643_v1 = vmax.f32 %v1641_v41, %v1642_v22  ;;  %v1527_v45 = vmul.f32 %v4432_v6, %v1316_v63 }
 0x239   :  { %v4760_v43 = vpop.eup %3228  ;;  %3242 = vpow2.f32 %v1841_v36  ;;  %v1651_v38 = vsel %vm142_vm0, %v1560_v62, -inf  ;;  %v1559_v49 = vmul.f32 %v4432_v6, %v1476_v21 }
 0x23a   :  { %v4763_v20 = vpop.eup %3230  ;;  %v1926_v13 = vsel %vm142_vm0, %v4760_v43, 0.0  ;;  %v2063_v48 = vmul.f32 %v3227_v25, %v2031_v47  ;;  %v1652_v46 = vmax.f32 %v1650_v37, %v1651_v38  ;;  %v1685_v30 = vsub.f32 %v1525_v17, %v1643_v1 }
 0x23b   :  { %v1927_v3 = vsel %vm142_vm0, %v4763_v20, 0.0  ;;  %v4772_v4 = vpop.eup %3232  ;;  %v1717_v50 = vsub.f32 %v1557_v0, %v1643_v1  ;;  %v1647_v31 = vsel %vm142_vm0, %v1527_v45, -inf  ;;  %v1648_v34 = vsel %vm142_vm0, %v1559_v49, -inf  ;;  %v1486_v0 = vpop.permute.xlu1 %1485 }
 0x23c   :  { %v1928_v14 = vadd.f32 %v1927_v3, %v1926_v13  ;;  %v4776_v11 = vpop.eup %3234  ;;  %v4779_v12 = vmul.f32 %v4671_v26, %v2063_v48  ;;  %v4782_v54 = vmul.f32 %v4680_v56, %v2063_v48  ;;  %v1923_v10 = vsel %vm142_vm0, %v4772_v4, 0.0 }
 0x23d   :  { %v1924_v55 = vsel %vm142_vm0, %v4776_v11, 0.0  ;;  %v1688_v44 = vsub.f32 %v1528_v5, %v1652_v46  ;;  %v1775_v56 = vmul.f32 1.442695, %v1685_v30  ;;  %v1839_v2 = vmul.f32 1.442695, %v1717_v50 }
 0x23e   :  { %3244 = vrcp.f32 %v1928_v14  ;;  %2159 = vst.msk [vmem:[%s5125_s5 + $0xa0] sm:$0xff] %vm142_vm0, %v4779_v12  ;;  %2191 = vst.msk [vmem:[%s5125_s5 + $0x1a0] sm:$0xff] %vm142_vm0, %v4782_v54  ;;  %v1925_v26 = vadd.f32 %v1924_v55, %v1923_v10  ;;  %v1720_v40 = vsub.f32 %v1560_v62, %v1652_v46  ;;  %v1649_v52 = vmax.f32 %v1647_v31, %v1648_v34 }
 0x23f   :  { %v3237_v16 = vpop.eup %3236  ;;  %v1781_v15 = vmul.f32 1.442695, %v1688_v44  ;;  %v1561_v63 = vmul.f32 %v4432_v6, %v1486_v0  ;;  %v1491_v30 = vpop.permute.xlu1 %1490 }
 0x240   :  { %v2002_v60 = vmul.f32 %v3237_v16, %v1922_v33  ;;  %3246 = vrcp.f32 %v1925_v26  ;;  %v1845_v59 = vmul.f32 1.442695, %v1720_v40  ;;  %v1687_v9 = vsub.f32 %v1527_v45, %v1649_v52  ;;  %v1331_v45 = vpop.permute.xlu0 %1330 }
 0x241   :  { %v4800_v23 = vpop.eup %3238  ;;  %3248 = vpow2.f32 %v1775_v56  ;;  %v1719_v7 = vsub.f32 %v1559_v49, %v1649_v52  ;;  %v1654_v3 = vsel %vm142_vm0, %v1561_v63, -inf }
 0x242   :  { %v2034_v39 = vsub.f32 2.0, %v2002_v60  ;;  %v3241_v18 = vpop.eup %3240  ;;  %v1932_v61 = vsel %vm142_vm0, %v4800_v23, 0.0  ;;  %3250 = vpow2.f32 %v1839_v2  ;;  %v1779_v5 = vmul.f32 1.442695, %v1687_v9 }
 0x243   :  { %v4804_v33 = vpop.eup %3242  ;;  %v2001_v19 = vmul.f32 %v3241_v18, %v1919_v35  ;;  %3252 = vpow2.f32 %v1781_v15  ;;  %v1843_v47 = vmul.f32 1.442695, %v1719_v7  ;;  %v1529_v35 = vmul.f32 %v4432_v6, %v1326_v27 }
 0x244   :  { %v2066_v8 = vmul.f32 %v3237_v16, %v2034_v39  ;;  %v1933_v25 = vsel %vm142_vm0, %v4804_v33, 0.0  ;;  %3254 = vpow2.f32 %v1845_v59  ;;  %v1530_v60 = vmul.f32 %v4432_v6, %v1331_v45 }
 0x245   :  { %v2033_v53 = vsub.f32 2.0, %v2001_v19  ;;  %v1934_v41 = vadd.f32 %v1933_v25, %v1932_v61  ;;  %v1653_v22 = vsel %vm142_vm0, %v1529_v35, -inf  ;;  %v3321_v25 = vld [vmem:[%s5120_s0 + $0xa0] sm:$0xff] }
 0x246   :  { %v4809_v36 = vmul.f32 %v4713_v51, %v2066_v8  ;;  %v4812_v17 = vmul.f32 %v4715_v57, %v2066_v8  ;;  %v1655_v46 = vmax.f32 %v1653_v22, %v1654_v3  ;;  %v2224_v9 = vmul.f32 %v3321_v25, %v4779_v12 }
 0x247   :  { %v2065_v51 = vmul.f32 %v3241_v18, %v2033_v53  ;;  %3256 = vrcp.f32 %v1934_v41 }
 0x248   :  { %v3245_v62 = vpop.eup %3244  ;;  %2162 = vst.msk [vmem:[%s5125_s5 + $0xb8] sm:$0xff] %vm142_vm0, %v4809_v36  ;;  %2194 = vst.msk [vmem:[%s5125_s5 + $0x1b8] sm:$0xff] %vm142_vm0, %v4812_v17  ;;  %3258 = vpow2.f32 %v1779_v5  ;;  %v3322_v5 = vld [vmem:[%s5120_s0 + $0x1a0] sm:$0xff] }
 0x249   :  { %v2004_v57 = vmul.f32 %v3245_v62, %v1928_v14  ;;  %v4827_v21 = vmul.f32 %v4731_v58, %v2065_v51  ;;  %v4830_v13 = vmul.f32 %v4739_v28, %v2065_v51  ;;  %3260 = vpow2.f32 %v1843_v47 }
 0x24a   :  { %v3247_v37 = vpop.eup %3246  ;;  %v2256_v47 = vmul.f32 %v3322_v5, %v4782_v54  ;;  %v3370_v51 = vmov 0.0  }
 0x24b   :  { %v2036_v48 = vsub.f32 2.0, %v2004_v57  ;;  %v4834_v1 = vpop.eup %3248  ;;  %2161 = vst.msk [vmem:[%s5125_s5 + $0xb0] sm:$0xff] %vm142_vm0, %v4827_v21  ;;  %2193 = vst.msk [vmem:[%s5125_s5 + $0x1b0] sm:$0xff] %vm142_vm0, %v4830_v13  ;;  %v2003_v58 = vmul.f32 %v3247_v37, %v1925_v26 }
 0x24c   :  { %v4846_v28 = vpop.eup %3250  ;;  %v1929_v14 = vsel %vm142_vm0, %v4834_v1, 0.0  ;;  %62 = vst.msk [vmem:[#allocation3] sm:$0x3] %vm61_vm2, %v3370_v51  ;;  %v2376_v22 = vsel %vm142_vm0, %v2256_v47, 0.0 }
 0x24d   :  { %v2068_v38 = vmul.f32 %v3245_v62, %v2036_v48  ;;  %v2035_v49 = vsub.f32 2.0, %v2003_v58  ;;  %v1930_v10 = vsel %vm142_vm0, %v4846_v28, 0.0  ;;  %v4852_v55 = vpop.eup %3252  ;;  %v3323_v48 = vld [vmem:[%s5120_s0 + $0xa8] sm:$0xff] }
 0x24e   :  { %v1931_v26 = vadd.f32 %v1930_v10, %v1929_v14  ;;  %v1938_v56 = vsel %vm142_vm0, %v4852_v55, 0.0  ;;  %v4863_v2 = vpop.eup %3254  ;;  %v2225_v3 = vmul.f32 %v3323_v48, %v4726_v29  ;;  %v3331_v48 = vld [vmem:[%s5120_s0 + $0xc8] sm:$0xff] }
 0x24f   :  { %v4855_v50 = vmul.f32 %v4760_v43, %v2068_v38  ;;  %v4858_v44 = vmul.f32 %v4763_v20, %v2068_v38  ;;  %v2067_v16 = vmul.f32 %v3247_v37, %v2035_v49  ;;  %v1689_v43 = vsub.f32 %v1529_v35, %v1655_v46  ;;  %v3324_v38 = vld [vmem:[%s5120_s0 + $0x1a8] sm:$0xff] }
 0x250   :  { %v1562_v20 = vmul.f32 %v4432_v6, %v1491_v30  ;;  %3262 = vrcp.f32 %v1931_v26  ;;  %v1939_v34 = vsel %vm142_vm0, %v4863_v2, 0.0  ;;  %v2257_v14 = vmul.f32 %v3324_v38, %v4729_v42  ;;  %v3325_v30 = vld [vmem:[%s5120_s0 + $0xb0] sm:$0xff] }
 0x251   :  { %2164 = vst.msk [vmem:[%s5125_s5 + $0xc8] sm:$0xff] %vm142_vm0, %v4855_v50  ;;  %2196 = vst.msk [vmem:[%s5125_s5 + $0x1c8] sm:$0xff] %vm142_vm0, %v4858_v44  ;;  %v3257_v40 = vpop.eup %3256  ;;  %v4877_v31 = vmul.f32 %v4772_v4, %v2067_v16  ;;  %v4880_v15 = vmul.f32 %v4776_v11, %v2067_v16  ;;  %v1940_v61 = vadd.f32 %v1939_v34, %v1938_v56  ;;  %v1656_v11 = vsel %vm142_vm0, %v1530_v60, -inf  ;;  %v3326_v16 = vld [vmem:[%s5120_s0 + $0x1b0] sm:$0xff]  ;;  %v3327_v34 = vld [vmem:[%s5120_s0 + $0xb8] sm:$0xff] }
 0x252   :  { %v4884_v39 = vpop.eup %3258  ;;  %v2006_v18 = vmul.f32 %v3257_v40, %v1934_v41  ;;  %v1721_v4 = vsub.f32 %v1561_v63, %v1655_v46  ;;  %v1783_v8 = vmul.f32 1.442695, %v1689_v43  ;;  %v1657_v19 = vsel %vm142_vm0, %v1562_v20, -inf }
 0x253   :  { %2163 = vst.msk [vmem:[%s5125_s5 + $0xc0] sm:$0xff] %vm142_vm0, %v4877_v31  ;;  %2195 = vst.msk [vmem:[%s5125_s5 + $0x1c0] sm:$0xff] %vm142_vm0, %v4880_v15  ;;  %v1935_v6 = vsel %vm142_vm0, %v4884_v39, 0.0  ;;  %v4899_v59 = vpop.eup %3260  ;;  %3264 = vrcp.f32 %v1940_v61  ;;  %v1658_v0 = vmax.f32 %v1656_v11, %v1657_v19  ;;  %v2377_v49 = vadd.f32 %v2376_v22, %v4737_v24 }
 0x254   :  { %v2038_v52 = vsub.f32 2.0, %v2006_v18  ;;  %v1936_v27 = vsel %vm142_vm0, %v4899_v59, 0.0  ;;  %v1847_v41 = vmul.f32 1.442695, %v1721_v4  ;;  %3266 = vpow2.f32 %v1783_v8  ;;  %v3329_v8 = vld [vmem:[%s5120_s0 + $0xc0] sm:$0xff] }
 0x255   :  { %v1937_v53 = vadd.f32 %v1936_v27, %v1935_v6  ;;  %v1690_v12 = vsub.f32 %v1530_v60, %v1658_v0  ;;  %v1722_v57 = vsub.f32 %v1562_v20, %v1658_v0  ;;  %v2226_v29 = vmul.f32 %v3325_v30, %v4827_v21 }
 0x256   :  { %v2070_v7 = vmul.f32 %v3257_v40, %v2038_v52  ;;  %v2378_v24 = vsel %vm142_vm0, %v2257_v14, 0.0  ;;  %v3334_v14 = vld [vmem:[%s5120_s0 + $0x1d0] sm:$0xff] }
 0x257   :  { %3268 = vrcp.f32 %v1937_v53  ;;  %v1849_v63 = vmul.f32 1.442695, %v1722_v57  ;;  %v2379_v18 = vadd.f32 %v2378_v24, %v2377_v49  ;;  %v2311_v11 = vsel %vm142_vm0, %v2226_v29, 0.0 }
 0x258   :  { %v4913_v35 = vmul.f32 %v4800_v23, %v2070_v7  ;;  %v4916_v62 = vmul.f32 %v4804_v33, %v2070_v7  ;;  %3270 = vpow2.f32 %v1847_v41  ;;  %v2307_v23 = vsel %vm142_vm0, %v2224_v9, 0.0  ;;  %v3330_v9 = vld [vmem:[%s5120_s0 + $0x1c0] sm:$0xff] }
 0x259   :  { %v1785_v33 = vmul.f32 1.442695, %v1690_v12  ;;  %v2308_v46 = vadd.f32 %v2307_v23, %v4734_v32  ;;  %v2309_v32 = vsel %vm142_vm0, %v2225_v3, 0.0  ;;  %v2260_v7 = vmul.f32 %v3330_v9, %v4880_v15 }
 0x25a   :  { %2166 = vst.msk [vmem:[%s5125_s5 + $0xd8] sm:$0xff] %vm142_vm0, %v4913_v35  ;;  %2198 = vst.msk [vmem:[%s5125_s5 + $0x1d8] sm:$0xff] %vm142_vm0, %v4916_v62  ;;  %v3263_v54 = vpop.eup %3262  ;;  %v2229_v3 = vmul.f32 %v3331_v48, %v4855_v50 }
 0x25b   :  { %v2005_v37 = vmul.f32 %v3263_v54, %v1931_v26  ;;  %3272 = vpow2.f32 %v1785_v33  ;;  %v2258_v26 = vmul.f32 %v3326_v16, %v4830_v13  ;;  %v2310_v43 = vadd.f32 %v2309_v32, %v2308_v46 }
 0x25c   :  { %3274 = vpow2.f32 %v1849_v63  ;;  %v2227_v13 = vmul.f32 %v3327_v34, %v4809_v36  ;;  %v2384_v57 = vsel %vm142_vm0, %v2260_v7, 0.0 }
 0x25d   :  { %v3265_v58 = vpop.eup %3264  ;;  %v2037_v45 = vsub.f32 2.0, %v2005_v37  ;;  %v2380_v52 = vsel %vm142_vm0, %v2258_v26, 0.0 }
 0x25e   :  { %v2008_v10 = vmul.f32 %v3265_v58, %v1940_v61  ;;  %v4949_v56 = vpop.eup %3266  ;;  %v2381_v5 = vadd.f32 %v2380_v52, %v2379_v18  ;;  %v2313_v47 = vsel %vm142_vm0, %v2227_v13, 0.0 }
 0x25f   :  { %v2069_v42 = vmul.f32 %v3263_v54, %v2037_v45  ;;  %v1941_v6 = vsel %vm142_vm0, %v4949_v56, 0.0  ;;  %v2317_v45 = vsel %vm142_vm0, %v2229_v3, 0.0 }
 0x260   :  { %v2040_v60 = vsub.f32 2.0, %v2008_v10 }
 0x261   :  { %v2101_v20 = vmul.f32 %v4834_v1, %v2069_v42  ;;  %v2133_v40 = vmul.f32 %v4846_v28, %v2069_v42  ;;  %v3269_v21 = vpop.eup %3268  ;;  %v3328_v1 = vld [vmem:[%s5120_s0 + $0x1b8] sm:$0xff] }
 0x262   :  { %v2072_v61 = vmul.f32 %v3265_v58, %v2040_v60  ;;  %v4961_v4 = vpop.eup %3270  ;;  %v2259_v28 = vmul.f32 %v3328_v1, %v4812_v17  ;;  %v2007_v36 = vmul.f32 %v3269_v21, %v1937_v53  ;;  %v2228_v17 = vmul.f32 %v3329_v8, %v4877_v31  ;;  %v3332_v58 = vld [vmem:[%s5120_s0 + $0x1c8] sm:$0xff]  ;;  %v3335_v42 = vld [vmem:[%s5120_s0 + $0xd8] sm:$0xff] }
 0x263   :  { %2165 = vst.msk [vmem:[%s5125_s5 + $0xd0] sm:$0xff] %vm142_vm0, %v2101_v20  ;;  %2197 = vst.msk [vmem:[%s5125_s5 + $0x1d0] sm:$0xff] %vm142_vm0, %v2133_v40  ;;  %v1942_v25 = vsel %vm142_vm0, %v4961_v4, 0.0  ;;  %v2312_v31 = vadd.f32 %v2311_v11, %v2310_v43  ;;  %v2262_v46 = vmul.f32 %v3334_v14, %v2133_v40  ;;  %v2231_v32 = vmul.f32 %v3335_v42, %v4913_v35  ;;  %v3336_v60 = vld [vmem:[%s5120_s0 + $0x1d8] sm:$0xff]  ;;  %v3337_v43 = vld [vmem:[%s5120_s0 + $0xe0] sm:$0xff] }
 0x264   :  { %v4982_v19 = vmul.f32 %v4852_v55, %v2072_v61  ;;  %v4985_v27 = vmul.f32 %v4863_v2, %v2072_v61  ;;  %v2039_v53 = vsub.f32 2.0, %v2007_v36  ;;  %v1943_v41 = vadd.f32 %v1942_v25, %v1941_v6  ;;  %v3338_v40 = vld [vmem:[%s5120_s0 + $0x1e0] sm:$0xff]  ;;  %v3339_v8 = vld [vmem:[%s5120_s0 + $0xe8] sm:$0xff] }
 0x265   :  { %v4993_v0 = vpop.eup %3272  ;;  %v2382_v51 = vsel %vm142_vm0, %v2259_v28, 0.0  ;;  %v2315_v12 = vsel %vm142_vm0, %v2228_v17, 0.0  ;;  %v2314_v63 = vadd.f32 %v2313_v47, %v2312_v31  ;;  %v2388_v30 = vsel %vm142_vm0, %v2262_v46, 0.0  ;;  %v3340_v25 = vld [vmem:[%s5120_s0 + $0x1e8] sm:$0xff] }
 0x266   :  { %2168 = vst.msk [vmem:[%s5125_s5 + $0xe8] sm:$0xff] %vm142_vm0, %v4982_v19  ;;  %2200 = vst.msk [vmem:[%s5125_s5 + $0x1e8] sm:$0xff] %vm142_vm0, %v4985_v27  ;;  %v5005_v55 = vpop.eup %3274  ;;  %v2071_v2 = vmul.f32 %v3269_v21, %v2039_v53  ;;  %3276 = vrcp.f32 %v1943_v41  ;;  %v1944_v15 = vsel %vm142_vm0, %v4993_v0, 0.0  ;;  %v2383_v22 = vadd.f32 %v2382_v51, %v2381_v5 }
 0x267   :  { %v1945_v33 = vsel %vm142_vm0, %v5005_v55, 0.0  ;;  %v2316_v50 = vadd.f32 %v2315_v12, %v2314_v63  ;;  %v2263_v24 = vmul.f32 %v3336_v60, %v4916_v62  ;;  %v2321_v61 = vsel %vm142_vm0, %v2231_v32, 0.0 }
 0x268   :  { %v2103_v54 = vmul.f32 %v4884_v39, %v2071_v2  ;;  %v2135_v23 = vmul.f32 %v4899_v59, %v2071_v2  ;;  %v1946_v37 = vadd.f32 %v1945_v33, %v1944_v15  ;;  %v2261_v39 = vmul.f32 %v3332_v58, %v4858_v44  ;;  %v3333_v59 = vld [vmem:[%s5120_s0 + $0xd0] sm:$0xff] }
 0x269   :  { %v2230_v38 = vmul.f32 %v3333_v59, %v2101_v20  ;;  %v2385_v44 = vadd.f32 %v2384_v57, %v2383_v22  ;;  %v2318_v29 = vadd.f32 %v2317_v45, %v2316_v50  ;;  %v2390_v6 = vsel %vm142_vm0, %v2263_v24, 0.0  ;;  %v3343_v22 = vld [vmem:[%s5120_s0 + $0xf8] sm:$0xff] }
 0x26a   :  { %2167 = vst.msk [vmem:[%s5125_s5 + $0xe0] sm:$0xff] %vm142_vm0, %v2103_v54  ;;  %2199 = vst.msk [vmem:[%s5125_s5 + $0x1e0] sm:$0xff] %vm142_vm0, %v2135_v23  ;;  %3278 = vrcp.f32 %v1946_v37  ;;  %v2386_v49 = vsel %vm142_vm0, %v2261_v39, 0.0  ;;  %v2232_v20 = vmul.f32 %v3337_v43, %v2103_v54  ;;  %v2264_v21 = vmul.f32 %v3338_v40, %v2135_v23 }
 0x26b   :  { %v2319_v10 = vsel %vm142_vm0, %v2230_v38, 0.0  ;;  %v2387_v16 = vadd.f32 %v2386_v49, %v2385_v44  ;;  %v2233_v17 = vmul.f32 %v3339_v8, %v4982_v19  ;;  %v2265_v9 = vmul.f32 %v3340_v25, %v4985_v27  ;;  %v3341_v19 = vld [vmem:[%s5120_s0 + $0xf0] sm:$0xff] }
 0x26c   :  { %v2320_v34 = vadd.f32 %v2319_v10, %v2318_v29  ;;  %v2323_v62 = vsel %vm142_vm0, %v2232_v20, 0.0  ;;  %v2392_v1 = vsel %vm142_vm0, %v2264_v21, 0.0 }
 0x26d   :  { %v2389_v13 = vadd.f32 %v2388_v30, %v2387_v16  ;;  %v2325_v15 = vsel %vm142_vm0, %v2233_v17, 0.0  ;;  %v2394_v47 = vsel %vm142_vm0, %v2265_v9, 0.0 }
 0x26e   :  { %v2322_v11 = vadd.f32 %v2321_v61, %v2320_v34 }
 0x26f   :  { %v2391_v52 = vadd.f32 %v2390_v6, %v2389_v13 }
 0x270   :  { %v3277_v26 = vpop.eup %3276  ;;  %v2324_v53 = vadd.f32 %v2323_v62, %v2322_v11 }
 0x271   :  { %v2009_v18 = vmul.f32 %v3277_v26, %v1943_v41  ;;  %v2393_v41 = vadd.f32 %v2392_v1, %v2391_v52 }
 0x272   :  { %v2326_v57 = vadd.f32 %v2325_v15, %v2324_v53 }
 0x273   :  { %v2041_v35 = vsub.f32 2.0, %v2009_v18  ;;  %v2395_v12 = vadd.f32 %v2394_v47, %v2393_v41 }
 0x274   :  { %v3279_v28 = vpop.eup %3278 }
 0x275   :  { %v2073_v36 = vmul.f32 %v3277_v26, %v2041_v35  ;;  %v2010_v7 = vmul.f32 %v3279_v28, %v1946_v37  ;;  %v2203_v26 = vld [vmem:[#allocation3] sm:$0x3] }
 0x277   :  { %v2105_v31 = vmul.f32 %v4949_v56, %v2073_v36  ;;  %v2137_v5 = vmul.f32 %v4961_v4, %v2073_v36  ;;  %v2042_v2 = vsub.f32 2.0, %v2010_v7  ;;  %v3342_v56 = vld [vmem:[%s5120_s0 + $0x1f0] sm:$0xff] }
 0x279   :  { %2169 = vst.msk [vmem:[%s5125_s5 + $0xf0] sm:$0xff] %vm142_vm0, %v2105_v31  ;;  %2201 = vst.msk [vmem:[%s5125_s5 + $0x1f0] sm:$0xff] %vm142_vm0, %v2137_v5  ;;  %v2234_v27 = vmul.f32 %v3341_v19, %v2105_v31  ;;  %v2266_v4 = vmul.f32 %v3342_v56, %v2137_v5  ;;  %v2074_v51 = vmul.f32 %v3279_v28, %v2042_v2 }
 0x27b   :  { %v2396_v54 = vsel %vm142_vm0, %v2266_v4, 0.0  ;;  %v2106_v23 = vmul.f32 %v4993_v0, %v2074_v51  ;;  %v2138_v33 = vmul.f32 %v5005_v55, %v2074_v51  ;;  %v2327_v63 = vsel %vm142_vm0, %v2234_v27, 0.0  ;;  %v3344_v0 = vld [vmem:[%s5120_s0 + $0x1f8] sm:$0xff]  ;;  %s3371_s0 = smov [#allocation3]  }
 0x27c   :  { %v2397_v48 = vadd.f32 %v2396_v54, %v2395_v12  ;;  %v2328_v3 = vadd.f32 %v2327_v63, %v2326_v57 }
 0x27d   :  { %2170 = vst.msk [vmem:[%s5125_s5 + $0xf8] sm:$0xff] %vm142_vm0, %v2106_v23  ;;  %2202 = vst.msk [vmem:[%s5125_s5 + $0x1f8] sm:$0xff] %vm142_vm0, %v2138_v33  ;;  %v2235_v37 = vmul.f32 %v3343_v22, %v2106_v23  ;;  %v2267_v55 = vmul.f32 %v3344_v0, %v2138_v33  ;;  %s2426_s5 = sshll.u32 %s3371_s0, 4  ;;  %s2427_s5 = int_to_ptr.vmem [resolvable:$true] %s2426_s5 }
 0x27e   :  { %s3345_s29 = scalar_lea.vmem %s2427_s5, 32  ;;  %p3350_p1 = scmp.lt.s32.totalorder %s2427_s5, %s2427_s5 }
 0x27f   :  { %v2398_v58 = vsel %vm142_vm0, %v2267_v55, 0.0  ;;  %v2329_v39 = vsel %vm142_vm0, %v2235_v37, 0.0  ;;  %p3346_p0 = scmp.ne.s32.totalorder %s2427_s5, %s3345_s29  ;;  %p3351_p2 = scmp.lt.s32.totalorder %s3345_s29, %s3345_s29 }
 0x280   :  { %v2330_v59 = vadd.f32 %v2329_v39, %v2328_v3  ;;  %v2399_v38 = vadd.f32 %v2398_v58, %v2397_v48 }
 0x281   :  { %p3352_p3 = por %p3351_p2, %p3350_p1 }
 0x282   :  { %v2331_v14 = vrot.slane %v2330_v59, 4  ;;  %v2400_v46 = vrot.slane %v2399_v38, 4 }
 0x283   :  { %p3353_p4 = pnand %p3352_p3, %p3346_p0 }
 0x284   :  { %v2332_v50 = vadd.f32 %v2331_v14, %v2330_v59  ;;  %v2401_v44 = vadd.f32 %v2400_v46, %v2399_v38 }
 0x286   :  { %v2333_v45 = vrot.slane %v2332_v50, 2  ;;  %v2402_v49 = vrot.slane %v2401_v44, 2 }
 0x288   :  { %v2334_v10 = vadd.f32 %v2333_v45, %v2332_v50  ;;  %v2403_v30 = vadd.f32 %v2402_v49, %v2401_v44 }
 0x28a   :  { %v2335_v29 = vrot.slane %v2334_v10, 1  ;;  %v2404_v16 = vrot.slane %v2403_v30, 1 }
 0x28c   :  { %v2336_v42 = vadd.f32 %v2335_v29, %v2334_v10  ;;  %v2405_v32 = vadd.f32 %v2404_v16, %v2403_v30 }
 0x28e   :  { %v2409_v60 = vsel %vm2408_vm3, %v2405_v32, %v2336_v42 }
 0x28f   :  { %v2411_v24 = vadd.f32 %v2409_v60, %v2203_v26 }
 0x291   :  { %2413 = vst.msk [vmem:[#allocation3] sm:$0x3] %vm61_vm2, %v2411_v24 }
 0x292   :  { %3356 = shalt.err (!%p3353_p4)
}
 0x293   :  { %s3357_s6 = scalar_lea.hbm %s5124_s4, 32 }
 0x294   :  { %p3358_p5 = scmp.ne.s32.totalorder %s5124_s4, %s3357_s6  ;;  %p3361_p6 = scmp.lt.u32.totalorder %s3357_s6, %s5124_s4 }
 0x296   :  { %p3363_p7 = pnand %p3361_p6, %p3358_p5 }
 0x298   :  { %3366 = shalt.err (!%p3363_p7)
}
 0x299   :  { %2429 = dma.vmem_to_hbm [thread:$0]  %s2427_s5, 32, %s5124_s4, [#allocation4]  }
 0x29a   :  { %3367 = dma.done.wait [#allocation4], 32  }
 0x29b   :  { %3368 = vsyncadd [#allocation4], 4294967264 }
 0x29c   :  { %2445 = vsyncpa [#allocation4], 1 }

</bundles_post_ra>
